<compile_context>
chip_gen: v7x
topology: tpu7x:2x2x1
jax: 0.10.0
libtpu: 0.0.40
codegen_flags: <defaults>
</compile_context>

<pallas_src>
import jax
import jax.numpy as jnp
from jax.experimental import pallas as pl
from jax.experimental.pallas import tpu as pltpu

_LANE = 128
_SUBLANE = 8
# Per batch-row VMEM cost: 2 inputs + 1 output, each double-buffered, each
# lane-padded to 128 lanes of f32 -> 6 * 128 * 4 bytes per row.
_VMEM_BYTES_PER_ROW = 6 * _LANE * 4
_DEFAULT_VMEM_BUDGET = 12 << 20     # stays under v5e's 16 MiB default scoped VMEM
_SPLIT_THRESHOLD = 2048             # min batch worth >=2 grid steps (v7x megacore)


def _round_up(x, m):
    return (x + m - 1) // m * m


def init_mlp_params(key, ob_dim, size, n_layers=2):
    """Deterministic init mimicking build_mlp(ob_dim -> [size]*n_layers -> ob_dim)."""
    assert n_layers == 2  # TODO(synk): generalize slab/kernel to arbitrary rnd_n_layers
    dims = [(ob_dim, size), (size, size), (size, ob_dim)]
    params = []
    for fan_in, fan_out in dims:
        key, wk, bk = jax.random.split(key, 3)
        bound = 1.0 / jnp.sqrt(fan_in)
        w = jax.random.uniform(wk, (fan_in, fan_out), jnp.float32, -bound, bound)
        b = jax.random.uniform(bk, (1, fan_out), jnp.float32, -bound, bound)
        params.append((w, b))
    return params


def pack_params(params, ob_dim, size):
    """Pack W0,b0,W1,b1,W2,b2 into ONE f32 slab (done once at init time).

    Row offsets are multiples of 8 so the in-kernel static slices stay
    sublane-aligned.  Returns (slab, offsets) with offsets = (w0,w1,w2,b0,b1,b2)
    row offsets.
    """
    (w0, b0), (w1, b1), (w2, b2) = params
    D, S = ob_dim, size
    C = max(D, S)
    r_w0 = 0
    r_w1 = r_w0 + _round_up(D, _SUBLANE)
    r_w2 = r_w1 + _round_up(S, _SUBLANE)
    r_b0 = r_w2 + _round_up(S, _SUBLANE)
    r_b1 = r_b0 + _SUBLANE
    r_b2 = r_b1 + _SUBLANE
    rows = _round_up(r_b2 + _SUBLANE, _SUBLANE)
    slab = jnp.zeros((rows, C), jnp.float32)
    slab = slab.at[r_w0:r_w0 + D, :S].set(w0)
    slab = slab.at[r_w1:r_w1 + S, :S].set(w1)
    slab = slab.at[r_w2:r_w2 + S, :D].set(w2)
    slab = slab.at[r_b0, :S].set(b0.reshape(-1))
    slab = slab.at[r_b1, :S].set(b1.reshape(-1))
    slab = slab.at[r_b2, :D].set(b2.reshape(-1))
    return slab, (r_w0, r_w1, r_w2, r_b0, r_b1, r_b2)


def _make_kernel(D, S, offsets):
    r_w0, r_w1, r_w2, r_b0, r_b1, r_b2 = offsets

    def kernel(ob_ref, next_ref, slab_ref, err_ref):
        # Static, sublane-aligned slices of the resident weight slab.
        w0 = slab_ref[r_w0:r_w0 + D, 0:S]          # (D, S)
        w1 = slab_ref[r_w1:r_w1 + S, 0:S]          # (S, S)
        w2 = slab_ref[r_w2:r_w2 + S, 0:D]          # (S, D)
        b0 = slab_ref[r_b0:r_b0 + 1, 0:S]          # (1, S)
        b1 = slab_ref[r_b1:r_b1 + 1, 0:S]          # (1, S)
        b2 = slab_ref[r_b2:r_b2 + 1, 0:D]          # (1, D)

        # MLP forward (tanh hidden, identity output), all f32 on MXU/EUP.
        h = jnp.tanh(jnp.dot(ob_ref[...], w0,
                             preferred_element_type=jnp.float32) + b0)
        h = jnp.tanh(jnp.dot(h, w1,
                             preferred_element_type=jnp.float32) + b1)
        pred = jnp.dot(h, w2, preferred_element_type=jnp.float32) + b2

        diff = pred - next_ref[...]                # (tile_b, D)
        # Feature-axis reduce straight to a (tile_b, 1) column.  Output is only
        # tile_b*4 bytes, so the masked column store is far cheaper than the
        # XLU transpose a lane-dense (1, tile_b) row would have required.
        err2 = jnp.sum(diff * diff, axis=1, keepdims=True)
        err_ref[...] = jnp.sqrt(err2)

    return kernel


def _choose_tile(B, max_tile_rows):
    """Pick the batch tile from the VMEM budget (and optional override)."""
    budget_rows = _DEFAULT_VMEM_BUDGET // _VMEM_BYTES_PER_ROW
    max_tile = max(_LANE, budget_rows // _LANE * _LANE)        # multiple of 128
    if max_tile_rows is not None:
        max_tile = max(_LANE, min(max_tile, _round_up(int(max_tile_rows), _LANE)))
    if B <= max_tile:
        if B >= _SPLIT_THRESHOLD:
            # Two grid steps so the "parallel" axis shards across v7x's 2 TCs.
            return _round_up(pl.cdiv(B, 2), _LANE)
        return B          # one full-array block, grid=(1,) (best on 1-TC chips)
    return max_tile


def pred_error_forward(ob_no, next_ob_no, slab, offsets, size, *,
                       max_tile_rows=None):
    """error[i] = || MLP(ob_no[i]) - next_ob_no[i] ||_2 ; returns shape (batch,)."""
    B, D = ob_no.shape
    S = size

    tile_b = _choose_tile(B, max_tile_rows)
    num_tiles = pl.cdiv(B, tile_b)

    # Explicit VMEM cap with headroom: double-buffered blocks + resident slab.
    # Stays well under v7x's 64 MiB physical VMEM.
    need = tile_b * _VMEM_BYTES_PER_ROW + 2 * int(slab.size) * 4 + (2 << 20)
    vmem_limit = int(min(max(need, 16 << 20), 40 << 20))

    cost = pl.CostEstimate(
        flops=2 * B * (D * S + S * S + S * D + D),
        transcendentals=2 * B * S,
        bytes_accessed=(2 * B * D + B + int(slab.size)) * 4,
    )

    err_col = pl.pallas_call(
        _make_kernel(D, S, offsets),
        out_shape=jax.ShapeDtypeStruct((B, 1), jnp.float32),
        grid=(num_tiles,),
        in_specs=[
            pl.BlockSpec((tile_b, D), lambda i: (i, 0)),   # ob_no tile
            pl.BlockSpec((tile_b, D), lambda i: (i, 0)),   # next_ob_no tile
            pl.BlockSpec(slab.shape, lambda i: (0, 0)),    # weight slab (resident)
        ],
        out_specs=pl.BlockSpec((tile_b, 1), lambda i: (i, 0)),
        compiler_params=pltpu.CompilerParams(
            dimension_semantics=("parallel",),
            vmem_limit_bytes=vmem_limit),
        cost_estimate=cost,
    )(ob_no, next_ob_no, slab)

    return err_col[:, 0]   # (batch,)


def pred_error_reference(ob_no, next_ob_no, params):
    hi = jax.lax.Precision.HIGHEST
    (w0, b0), (w1, b1), (w2, b2) = params
    h = jnp.tanh(jnp.dot(ob_no, w0, precision=hi) + b0)
    h = jnp.tanh(jnp.dot(h, w1, precision=hi) + b1)
    pred = jnp.dot(h, w2, precision=hi) + b2
    return jnp.linalg.norm(pred - next_ob_no, axis=1)


if __name__ == "__main__":
    # Small hparams consistent with the module: ob_dim, rnd_size, rnd_n_layers.
    ob_dim, size, n_layers = 16, 32, 2

    key = jax.random.PRNGKey(0)
    key, k_params = jax.random.split(key)
    params = init_mlp_params(k_params, ob_dim, size, n_layers)
    slab, offsets = pack_params(params, ob_dim, size)   # packed once at "init"

    # Case 1: whole batch in a single full-array block (grid=(1,)).
    batch = 256
    key, k_ob, k_next = jax.random.split(key, 3)
    ob_no = jax.random.normal(k_ob, (batch, ob_dim), jnp.float32)
    next_ob_no = jax.random.normal(k_next, (batch, ob_dim), jnp.float32)
    err = jax.block_until_ready(
        pred_error_forward(ob_no, next_ob_no, slab, offsets, size))
    ref = pred_error_reference(ob_no, next_ob_no, params)
    assert err.shape == (batch,)
    assert jnp.allclose(err, ref, atol=1e-4, rtol=1e-4), (err, ref)

    # Case 2: ragged batch + multi-step grid (exercises the partial-final-block
    # path with no wrapper padding; 2 grid steps -> both v7x TCs get work).
    batch2 = 200
    key, k_ob2, k_next2 = jax.random.split(key, 3)
    ob2 = jax.random.normal(k_ob2, (batch2, ob_dim), jnp.float32)
    next2 = jax.random.normal(k_next2, (batch2, ob_dim), jnp.float32)
    err2 = jax.block_until_ready(
        pred_error_forward(ob2, next2, slab, offsets, size, max_tile_rows=128))
    ref2 = pred_error_reference(ob2, next2, params)
    assert err2.shape == (batch2,)
    assert jnp.allclose(err2, ref2, atol=1e-4, rtol=1e-4), (err2, ref2)

    print("KERNEL_OK")
</pallas_src>

<mosaic_0001>
module attributes {stable_mosaic.version = 11 : i64} {
  func.func @kernel(%arg0: i32, %arg1: memref<256x16xf32, #tpu.memory_space<vmem>>, %arg2: memref<256x16xf32, #tpu.memory_space<vmem>>, %arg3: memref<104x32xf32, #tpu.memory_space<vmem>>, %arg4: memref<256x1xf32, #tpu.memory_space<vmem>>) attributes {dimension_semantics = [#tpu.dimension_semantics<parallel>], iteration_bounds = array<i64: 1>, scalar_prefetch = 0 : i64, scratch_operands = 0 : i64, tpu.core_type = #tpu.core_type<tc>, window_params = [{transform_indices = @transform_0, window_bounds = array<i64: 256, 16>}, {transform_indices = @transform_1, window_bounds = array<i64: 256, 16>}, {pipeline_mode = #tpu.pipeline_mode<synchronous>, transform_indices = @transform_2, window_bounds = array<i64: 104, 32>}, {transform_indices = @transform_3, window_bounds = array<i64: 256, 1>}]} {
    %c0 = arith.constant 0 : index
    %c0_0 = arith.constant 0 : index
    %0 = vector.load %arg3[%c0, %c0_0] : memref<104x32xf32, #tpu.memory_space<vmem>>, vector<16x32xf32>
    %c16 = arith.constant 16 : index
    %c0_1 = arith.constant 0 : index
    %1 = vector.load %arg3[%c16, %c0_1] : memref<104x32xf32, #tpu.memory_space<vmem>>, vector<32x32xf32>
    %c48 = arith.constant 48 : index
    %c0_2 = arith.constant 0 : index
    %2 = vector.load %arg3[%c48, %c0_2] : memref<104x32xf32, #tpu.memory_space<vmem>>, vector<32x16xf32>
    %c80 = arith.constant 80 : index
    %c0_3 = arith.constant 0 : index
    %3 = vector.load %arg3[%c80, %c0_3] : memref<104x32xf32, #tpu.memory_space<vmem>>, vector<1x32xf32>
    %c88 = arith.constant 88 : index
    %c0_4 = arith.constant 0 : index
    %4 = vector.load %arg3[%c88, %c0_4] : memref<104x32xf32, #tpu.memory_space<vmem>>, vector<1x32xf32>
    %c96 = arith.constant 96 : index
    %c0_5 = arith.constant 0 : index
    %5 = vector.load %arg3[%c96, %c0_5] : memref<104x32xf32, #tpu.memory_space<vmem>>, vector<1x16xf32>
    %c0_6 = arith.constant 0 : index
    %c0_7 = arith.constant 0 : index
    %6 = vector.load %arg1[%c0_6, %c0_7] : memref<256x16xf32, #tpu.memory_space<vmem>>, vector<256x16xf32>
    %cst = arith.constant dense<0.000000e+00> : vector<256x32xf32>
    %7 = tpu.matmul %6, %0, %cst {dimension_numbers = #tpu.dot_dimension_numbers<[1], [0], [0], [1], [0, 0, 1, 1], [], []>} : vector<256x16xf32>, vector<16x32xf32>, vector<256x32xf32> -> vector<256x32xf32>
    %8 = vector.broadcast %3 : vector<1x32xf32> to vector<256x32xf32>
    %9 = arith.addf %7, %8 : vector<256x32xf32>
    %10 = math.tanh %9 : vector<256x32xf32>
    %cst_8 = arith.constant dense<0.000000e+00> : vector<256x32xf32>
    %11 = tpu.matmul %10, %1, %cst_8 {dimension_numbers = #tpu.dot_dimension_numbers<[1], [0], [0], [1], [0, 0, 1, 1], [], []>} : vector<256x32xf32>, vector<32x32xf32>, vector<256x32xf32> -> vector<256x32xf32>
    %12 = vector.broadcast %4 : vector<1x32xf32> to vector<256x32xf32>
    %13 = arith.addf %11, %12 : vector<256x32xf32>
    %14 = math.tanh %13 : vector<256x32xf32>
    %cst_9 = arith.constant dense<0.000000e+00> : vector<256x16xf32>
    %15 = tpu.matmul %14, %2, %cst_9 {dimension_numbers = #tpu.dot_dimension_numbers<[1], [0], [0], [1], [0, 0, 1, 1], [], []>} : vector<256x32xf32>, vector<32x16xf32>, vector<256x16xf32> -> vector<256x16xf32>
    %16 = vector.broadcast %5 : vector<1x16xf32> to vector<256x16xf32>
    %17 = arith.addf %15, %16 : vector<256x16xf32>
    %c0_10 = arith.constant 0 : index
    %c0_11 = arith.constant 0 : index
    %18 = vector.load %arg2[%c0_10, %c0_11] : memref<256x16xf32, #tpu.memory_space<vmem>>, vector<256x16xf32>
    %19 = arith.subf %17, %18 : vector<256x16xf32>
    %20 = arith.mulf %19, %19 : vector<256x16xf32>
    %cst_12 = arith.constant dense<0.000000e+00> : vector<256xf32>
    %21 = vector.multi_reduction <add>, %20, %cst_12 [1] : vector<256x16xf32> to vector<256xf32>
    %22 = vector.shape_cast %21 : vector<256xf32> to vector<256x1xf32>
    %23 = math.sqrt %22 : vector<256x1xf32>
    %c0_13 = arith.constant 0 : index
    %c0_14 = arith.constant 0 : index
    %24 = vector.load %arg4[%c0_13, %c0_14] : memref<256x1xf32, #tpu.memory_space<vmem>>, vector<256x1xf32>
    tpu.vector_store %arg4[%c0_13, %c0_14], %23 {strides = array<i32>} : memref<256x1xf32, #tpu.memory_space<vmem>>, vector<256x1xf32>,
    return
  }
  func.func @transform_0(%arg0: i32) -> (i32, i32) {
    %c0_i32 = arith.constant 0 : i32
    %c0_i32_0 = arith.constant 0 : i32
    return %arg0, %c0_i32 : i32, i32
  }
  func.func @transform_1(%arg0: i32) -> (i32, i32) {
    %c0_i32 = arith.constant 0 : i32
    %c0_i32_0 = arith.constant 0 : i32
    return %arg0, %c0_i32 : i32, i32
  }
  func.func @transform_2(%arg0: i32) -> (i32, i32) {
    %c0_i32 = arith.constant 0 : i32
    %c0_i32_0 = arith.constant 0 : i32
    %c0_i32_1 = arith.constant 0 : i32
    return %c0_i32, %c0_i32_0 : i32, i32
  }
  func.func @transform_3(%arg0: i32) -> (i32, i32) {
    %c0_i32 = arith.constant 0 : i32
    %c0_i32_0 = arith.constant 0 : i32
    return %arg0, %c0_i32 : i32, i32
  }
}

</mosaic_0001>

<bundles_post_ra>
// kernel: tpu_custom_call.1
= control target key start
LH: loop header
LB: loop body
LE: loop exit
PB: predicated region body
PF: predicated region fallthrough
CT: control target
= control target key end

     0   :  { %vm63_vm0 = vcmask 130048   ;;  %vm421_vm1 = vcmask 261120   ;;  %vm1516_vm2 = vcmask 7168   ;;  %s2981_s2 = inlined_call_operand.vmem [shape: f32[104,32], index: 2, kind: input, shape index: {}]   ;;  %s2982_s0 = inlined_call_operand.vmem [shape: f32[256,16], index: 0, kind: input, shape index: {}]   ;;  %s2983_s1 = inlined_call_operand.vmem [shape: f32[256,16], index: 1, kind: input, shape index: {}]   ;;  %s2984_s3 = inlined_call_operand.vmem [shape: f32[256,1], index: 3, kind: output, shape index: {}]  }
   0x1   :  { %v14_v0 = vld [vmem:[%s2981_s2] sm:$0xff]  ;;  %v15_v1 = vld [vmem:[%s2981_s2 + $0x8] sm:$0xff]  ;;  %v29_v5 = vld [vmem:[%s2982_s0 + $0x10] sm:$0xff] }
   0x2   :  { %v1922_v2 = vpack.c.bf16 %v15_v1, %v14_v0  ;;  %v27_v3 = vld [vmem:[%s2982_s0] sm:$0xff]  ;;  %v28_v4 = vld [vmem:[%s2982_s0 + $0x8] sm:$0xff]  ;;  %v45_v8 = vld [vmem:[%s2982_s0 + $0x90] sm:$0xff] }
   0x3   :  { %1762 = vmatprep.mubr.msk.f32.mxu0 %vm63_vm0, %v27_v3  ;;  %v43_v6 = vld [vmem:[%s2982_s0 + $0x80] sm:$0xff]  ;;  %v44_v7 = vld [vmem:[%s2982_s0 + $0x88] sm:$0xff]  ;;  %v30_v9 = vld [vmem:[%s2982_s0 + $0x18] sm:$0xff] }
   0x4   :  { %1923 = vmatprep.subr.bf16.mxu0 %v1922_v2  ;;  %1942 = vmatprep.subr.bf16.mxu1 %v1922_v2  ;;  %v31_v10 = vld [vmem:[%s2982_s0 + $0x20] sm:$0xff]  ;;  %v46_v11 = vld [vmem:[%s2982_s0 + $0x98] sm:$0xff]  ;;  %v32_v13 = vld [vmem:[%s2982_s0 + $0x28] sm:$0xff] }
   0x5   :  { %1925 = vmatpush3.bf16.msra.mxu0 %v1922_v2  ;;  %1943 = vmatpush3.bf16.msra.mxu1 %v1922_v2  ;;  %v47_v12 = vld [vmem:[%s2982_s0 + $0xa0] sm:$0xff]  ;;  %v16_v14 = vld [vmem:[%s2981_s2 + $0x10] sm:$0xff]  ;;  %v17_v15 = vld [vmem:[%s2981_s2 + $0x18] sm:$0xff] }
   0x6   :  { %1786 = vmatprep.mubr.msk.f32.mxu1 %vm63_vm0, %v43_v6  ;;  %v33_v16 = vld [vmem:[%s2982_s0 + $0x30] sm:$0xff]  ;;  %v1926_v17 = vpack.c.bf16 %v17_v15, %v16_v14  ;;  %v18_v18 = vld [vmem:[%s2981_s2 + $0x20] sm:$0xff]  ;;  %v19_v19 = vld [vmem:[%s2981_s2 + $0x28] sm:$0xff] }
   0x7   :  { %v48_v20 = vld [vmem:[%s2982_s0 + $0xa8] sm:$0xff]  ;;  %v1930_v21 = vpack.c.bf16 %v19_v19, %v18_v18  ;;  %v49_v22 = vld [vmem:[%s2982_s0 + $0xb0] sm:$0xff]  ;;  %v34_v23 = vld [vmem:[%s2982_s0 + $0x38] sm:$0xff] }
   0x8   :  { %1763 = vmatmul.mubr.msk.f32.vlgmr.msra.gmra.mrb[0].mxu0 %vm63_vm0, %v28_v4  ;;  %1787 = vmatmul.mubr.msk.f32.vlgmr.msra.gmra.mrb[0].mxu1 %vm63_vm0, %v44_v7  ;;  %v35_v24 = vld [vmem:[%s2982_s0 + $0x40] sm:$0xff]  ;;  %v50_v25 = vld [vmem:[%s2982_s0 + $0xb8] sm:$0xff]  ;;  %v36_v27 = vld [vmem:[%s2982_s0 + $0x48] sm:$0xff] }
   0x9   :  { %1765 = vmatprep.mubr.msk.f32.mxu0 %vm63_vm0, %v29_v5  ;;  %1789 = vmatprep.mubr.msk.f32.mxu1 %vm63_vm0, %v45_v8  ;;  %v51_v26 = vld [vmem:[%s2982_s0 + $0xc0] sm:$0xff]  ;;  %v37_v28 = vld [vmem:[%s2982_s0 + $0x50] sm:$0xff]  ;;  %v52_v29 = vld [vmem:[%s2982_s0 + $0xc8] sm:$0xff] }
   0xa   :  { %1927 = vmatprep.subr.bf16.mxu1 %v1926_v17  ;;  %v53_v30 = vld [vmem:[%s2982_s0 + $0xd0] sm:$0xff]  ;;  %v38_v31 = vld [vmem:[%s2982_s0 + $0x58] sm:$0xff]  ;;  %v39_v32 = vld [vmem:[%s2982_s0 + $0x60] sm:$0xff] }
   0xb   :  { %1929 = vmatpush3.bf16.msra.mxu1 %v1926_v17  ;;  %v54_v33 = vld [vmem:[%s2982_s0 + $0xd8] sm:$0xff]  ;;  %v55_v34 = vld [vmem:[%s2982_s0 + $0xe0] sm:$0xff]  ;;  %v40_v35 = vld [vmem:[%s2982_s0 + $0x68] sm:$0xff] }
   0xc   :  { %1766 = vmatmul.mubr.msk.f32.gmra.mrb[2].mxu0 %vm63_vm0, %v30_v9  ;;  %1790 = vmatmul.mubr.msk.f32.gmra.mrb[2].mxu1 %vm63_vm0, %v46_v11  ;;  %v41_v36 = vld [vmem:[%s2982_s0 + $0x70] sm:$0xff]  ;;  %v56_v37 = vld [vmem:[%s2982_s0 + $0xe8] sm:$0xff]  ;;  %v42_v39 = vld [vmem:[%s2982_s0 + $0x78] sm:$0xff] }
   0xd   :  { %1768 = vmatprep.mubr.msk.f32.mxu0 %vm63_vm0, %v31_v10  ;;  %1792 = vmatprep.mubr.msk.f32.mxu1 %vm63_vm0, %v47_v12  ;;  %v57_v38 = vld [vmem:[%s2982_s0 + $0xf0] sm:$0xff]  ;;  %v58_v40 = vld [vmem:[%s2982_s0 + $0xf8] sm:$0xff]  ;;  %v22_v43 = vld [vmem:[%s2981_s2 + $0x40] sm:$0xff] }
   0xe   :  { %1931 = vmatprep.subr.bf16.mxu1 %v1930_v21  ;;  %v20_v41 = vld [vmem:[%s2981_s2 + $0x30] sm:$0xff]  ;;  %v21_v42 = vld [vmem:[%s2981_s2 + $0x38] sm:$0xff]  ;;  %v23_v45 = vld [vmem:[%s2981_s2 + $0x48] sm:$0xff] }
   0xf   :  { %1933 = vmatpush3.bf16.msra.mxu1 %v1930_v21  ;;  %v1934_v44 = vpack.c.bf16 %v21_v42, %v20_v41  ;;  %v1938_v46 = vpack.c.bf16 %v23_v45, %v22_v43  ;;  %v2317_v47 = vld [vmem:[%s2981_s2 + $0x50] ss:$0 sm:$0xff] }
  0x10   :  { %1769 = vmatmul.mubr.msk.f32.gmra.mrb[4].mxu0 %vm63_vm0, %v32_v13  ;;  %1793 = vmatmul.mubr.msk.f32.gmra.mrb[4].mxu1 %vm63_vm0, %v48_v20 }
  0x11   :  { %1771 = vmatprep.mubr.msk.f32.mxu0 %vm63_vm0, %v33_v16  ;;  %1795 = vmatprep.mubr.msk.f32.mxu1 %vm63_vm0, %v49_v22 }
  0x12   :  { %1935 = vmatprep.subr.bf16.mxu0 %v1934_v44 }
  0x13   :  { %1937 = vmatpush3.bf16.msra.mxu0 %v1934_v44 }
  0x14   :  { %1772 = vmatmul.mubr.msk.f32.gmra.mrb[6].mxu0 %vm63_vm0, %v34_v23  ;;  %1796 = vmatmul.mubr.msk.f32.gmra.mrb[6].mxu1 %vm63_vm0, %v50_v25 }
  0x15   :  { %1774 = vmatprep.mubr.msk.f32.mxu0 %vm63_vm0, %v35_v24  ;;  %1798 = vmatprep.mubr.msk.f32.mxu1 %vm63_vm0, %v51_v26 }
  0x16   :  { %1939 = vmatprep.subr.bf16.mxu0 %v1938_v46 }
  0x17   :  { %1941 = vmatpush3.bf16.msra.mxu0 %v1938_v46 }
  0x18   :  { %1775 = vmatmul.mubr.msk.f32.gmra.mrb[8].mxu0 %vm63_vm0, %v36_v27  ;;  %1799 = vmatmul.mubr.msk.f32.gmra.mrb[8].mxu1 %vm63_vm0, %v52_v29 }
  0x19   :  { %1777 = vmatprep.mubr.msk.f32.mxu0 %vm63_vm0, %v37_v28  ;;  %1801 = vmatprep.mubr.msk.f32.mxu1 %vm63_vm0, %v53_v30 }
  0x1c   :  { %1778 = vmatmul.mubr.msk.f32.gmra.mrb[10].mxu0 %vm63_vm0, %v38_v31  ;;  %1802 = vmatmul.mubr.msk.f32.gmra.mrb[10].mxu1 %vm63_vm0, %v54_v33 }
  0x1d   :  { %1780 = vmatprep.mubr.msk.f32.mxu0 %vm63_vm0, %v39_v32  ;;  %1804 = vmatprep.mubr.msk.f32.mxu1 %vm63_vm0, %v55_v34 }
  0x20   :  { %1781 = vmatmul.mubr.msk.f32.gmra.mrb[12].mxu0 %vm63_vm0, %v40_v35  ;;  %1805 = vmatmul.mubr.msk.f32.gmra.mrb[12].mxu1 %vm63_vm0, %v56_v37 }
  0x21   :  { %1783 = vmatprep.mubr.msk.f32.mxu0 %vm63_vm0, %v41_v36  ;;  %1807 = vmatprep.mubr.msk.f32.mxu1 %vm63_vm0, %v57_v38 }
  0x24   :  { %1784 = vmatmul.mubr.msk.f32.gmra.mrb[14].mxu0 %vm63_vm0, %v42_v39  ;;  %1808 = vmatmul.mubr.msk.f32.gmra.mrb[14].mxu1 %vm63_vm0, %v58_v40 }
  0xdb   :  { %v1764_v48 = vpop.f32.mrb[0].mxu0  ;;  %v2321_v52 = vpop.f32.mrb[0].mxu1 }
  0xdc   :  { %v232_v49 = vadd.f32 %v1764_v48, %v2317_v47  ;;  %v226_v50 = vpop.f32.mrb[1].mxu0  ;;  %v306_v53 = vpop.f32.mrb[1].mxu1  ;;  %v312_v42 = vadd.f32 %v2321_v52, %v2317_v47 }
  0xdd   :  { %v227_v51 = vadd.f32 %v2317_v47, %v226_v50  ;;  %v307_v32 = vadd.f32 %v2317_v47, %v306_v53 }
  0xdf   :  { %1944 = vtanh.f32 %v227_v51  ;;  %v1767_v54 = vpop.f32.mrb[2].mxu0  ;;  %v2325_v58 = vpop.f32.mrb[2].mxu1 }
  0xe0   :  { %1946 = vtanh.f32 %v232_v49  ;;  %v242_v55 = vadd.f32 %v1767_v54, %v2317_v47  ;;  %v236_v56 = vpop.f32.mrb[3].mxu0  ;;  %v2327_v59 = vpop.f32.mrb[3].mxu1  ;;  %v322_v48 = vadd.f32 %v2325_v58, %v2317_v47 }
  0xe1   :  { %v237_v57 = vadd.f32 %v2317_v47, %v236_v56  ;;  %v317_v44 = vadd.f32 %v2317_v47, %v2327_v59 }
  0xe3   :  { %1948 = vtanh.f32 %v237_v57  ;;  %v1770_v60 = vpop.f32.mrb[4].mxu0  ;;  %v2331_v0 = vpop.f32.mrb[4].mxu1 }
  0xe4   :  { %1950 = vtanh.f32 %v242_v55  ;;  %v252_v61 = vadd.f32 %v1770_v60, %v2317_v47  ;;  %v246_v62 = vpop.f32.mrb[5].mxu0  ;;  %v2333_v1 = vpop.f32.mrb[5].mxu1  ;;  %v332_v52 = vadd.f32 %v2331_v0, %v2317_v47 }
  0xe5   :  { %v247_v63 = vadd.f32 %v2317_v47, %v246_v62  ;;  %v327_v49 = vadd.f32 %v2317_v47, %v2333_v1 }
  0xe6   :  { %1952 = vtanh.f32 %v252_v61 }
  0xe7   :  { %1954 = vtanh.f32 %v247_v63  ;;  %v1773_v2 = vpop.f32.mrb[6].mxu0  ;;  %v2337_v7 = vpop.f32.mrb[6].mxu1 }
  0xe8   :  { %v262_v3 = vadd.f32 %v1773_v2, %v2317_v47  ;;  %v256_v4 = vpop.f32.mrb[7].mxu0  ;;  %v2340_v9 = vpop.f32.mrb[7].mxu1  ;;  %v342_v57 = vadd.f32 %v2337_v7, %v2317_v47 }
  0xe9   :  { %v1945_v5 = vpop.eup %1944  ;;  %v257_v6 = vadd.f32 %v2317_v47, %v256_v4  ;;  %v337_v54 = vadd.f32 %v2317_v47, %v2340_v9 }
  0xea   :  { %v1947_v8 = vpop.eup %1946  ;;  %1956 = vtanh.f32 %v262_v3  ;;  %1818 = vmatprep.mubr.msk.f32.mxu1 %vm421_vm1, %v1945_v5 }
  0xeb   :  { %1958 = vtanh.f32 %v257_v6  ;;  %v1776_v10 = vpop.f32.mrb[8].mxu0  ;;  %1819 = vmatmul.mubr.msk.f32.vlgmr.msra.gmra.mrb[16].mxu1 %vm421_vm1, %v1947_v8  ;;  %v2345_v15 = vpop.f32.mrb[8].mxu1 }
  0xec   :  { %v272_v11 = vadd.f32 %v1776_v10, %v2317_v47  ;;  %v266_v12 = vpop.f32.mrb[9].mxu0  ;;  %v2348_v17 = vpop.f32.mrb[9].mxu1  ;;  %v352_v61 = vadd.f32 %v2345_v15, %v2317_v47 }
  0xed   :  { %v1949_v13 = vpop.eup %1948  ;;  %v267_v14 = vadd.f32 %v2317_v47, %v266_v12  ;;  %v347_v58 = vadd.f32 %v2317_v47, %v2348_v17 }
  0xee   :  { %v1951_v16 = vpop.eup %1950  ;;  %1960 = vtanh.f32 %v272_v11  ;;  %1821 = vmatprep.mubr.msk.f32.mxu1 %vm421_vm1, %v1949_v13 }
  0xef   :  { %1962 = vtanh.f32 %v267_v14  ;;  %v1779_v18 = vpop.f32.mrb[10].mxu0  ;;  %1822 = vmatmul.mubr.msk.f32.gmra.mrb[18].mxu1 %vm421_vm1, %v1951_v16  ;;  %v2353_v24 = vpop.f32.mrb[10].mxu1  ;;  %v2422_v16 = vld [vmem:[%s2981_s2 + $0x58] ss:$0 sm:$0xff] }
  0xf0   :  { %v1953_v19 = vpop.eup %1952  ;;  %v282_v20 = vadd.f32 %v1779_v18, %v2317_v47  ;;  %v276_v21 = vpop.f32.mrb[11].mxu0  ;;  %v362_v1 = vadd.f32 %v2353_v24, %v2317_v47 }
  0xf1   :  { %v1955_v22 = vpop.eup %1954  ;;  %v277_v23 = vadd.f32 %v2317_v47, %v276_v21  ;;  %v2356_v25 = vpop.f32.mrb[11].mxu1 }
  0xf2   :  { %1964 = vtanh.f32 %v282_v20  ;;  %1824 = vmatprep.mubr.msk.f32.mxu1 %vm421_vm1, %v1955_v22  ;;  %v357_v62 = vadd.f32 %v2317_v47, %v2356_v25 }
  0xf3   :  { %1966 = vtanh.f32 %v277_v23  ;;  %v1782_v26 = vpop.f32.mrb[12].mxu0  ;;  %1825 = vmatmul.mubr.msk.f32.gmra.mrb[20].mxu1 %vm421_vm1, %v1953_v19  ;;  %v2362_v33 = vpop.f32.mrb[12].mxu1 }
  0xf4   :  { %v1957_v27 = vpop.eup %1956  ;;  %v292_v28 = vadd.f32 %v1782_v26, %v2317_v47  ;;  %v286_v29 = vpop.f32.mrb[13].mxu0  ;;  %v372_v5 = vadd.f32 %v2362_v33, %v2317_v47 }
  0xf5   :  { %v1959_v30 = vpop.eup %1958  ;;  %v287_v31 = vadd.f32 %v2317_v47, %v286_v29  ;;  %v366_v34 = vpop.f32.mrb[13].mxu1 }
  0xf6   :  { %1968 = vtanh.f32 %v292_v28  ;;  %1827 = vmatprep.mubr.msk.f32.mxu1 %vm421_vm1, %v1959_v30  ;;  %v367_v2 = vadd.f32 %v2317_v47, %v366_v34 }
  0xf7   :  { %1970 = vtanh.f32 %v287_v31  ;;  %v1785_v35 = vpop.f32.mrb[14].mxu0  ;;  %1828 = vmatmul.mubr.msk.f32.gmra.mrb[22].mxu1 %vm421_vm1, %v1957_v27  ;;  %v1809_v41 = vpop.f32.mrb[14].mxu1 }
  0xf8   :  { %v1961_v36 = vpop.eup %1960  ;;  %v302_v37 = vadd.f32 %v1785_v35, %v2317_v47  ;;  %v296_v38 = vpop.f32.mrb[15].mxu0  ;;  %1972 = vtanh.f32 %v307_v32  ;;  %v382_v9 = vadd.f32 %v1809_v41, %v2317_v47 }
  0xf9   :  { %v1963_v39 = vpop.eup %1962  ;;  %v297_v40 = vadd.f32 %v2317_v47, %v296_v38  ;;  %v376_v43 = vpop.f32.mrb[15].mxu1 }
  0xfa   :  { %1974 = vtanh.f32 %v302_v37  ;;  %1830 = vmatprep.mubr.msk.f32.mxu1 %vm421_vm1, %v1963_v39  ;;  %v377_v6 = vadd.f32 %v2317_v47, %v376_v43 }
  0xfb   :  { %1976 = vtanh.f32 %v297_v40  ;;  %1831 = vmatmul.mubr.msk.f32.gmra.mrb[24].mxu1 %vm421_vm1, %v1961_v36 }
  0xfc   :  { %v1965_v45 = vpop.eup %1964  ;;  %1978 = vtanh.f32 %v312_v42 }
  0xfd   :  { %v1967_v46 = vpop.eup %1966  ;;  %1980 = vtanh.f32 %v317_v44 }
  0xfe   :  { %1833 = vmatprep.mubr.msk.f32.mxu1 %vm421_vm1, %v1967_v46  ;;  %1982 = vtanh.f32 %v322_v48 }
  0xff   :  { %1834 = vmatmul.mubr.msk.f32.gmra.mrb[26].mxu1 %vm421_vm1, %v1965_v45  ;;  %1984 = vtanh.f32 %v327_v49 }
 0x100   :  { %v1969_v50 = vpop.eup %1968  ;;  %1986 = vtanh.f32 %v332_v52 }
 0x101   :  { %v1971_v51 = vpop.eup %1970  ;;  %1988 = vtanh.f32 %v337_v54 }
 0x102   :  { %1836 = vmatprep.mubr.msk.f32.mxu1 %vm421_vm1, %v1971_v51  ;;  %v1973_v53 = vpop.eup %1972  ;;  %1990 = vtanh.f32 %v342_v57 }
 0x103   :  { %1837 = vmatmul.mubr.msk.f32.gmra.mrb[28].mxu1 %vm421_vm1, %v1969_v50  ;;  %1992 = vtanh.f32 %v347_v58 }
 0x104   :  { %v1975_v55 = vpop.eup %1974  ;;  %1994 = vtanh.f32 %v352_v61 }
 0x105   :  { %v1977_v56 = vpop.eup %1976  ;;  %1996 = vtanh.f32 %v357_v62 }
 0x106   :  { %1839 = vmatprep.mubr.msk.f32.mxu1 %vm421_vm1, %v1977_v56  ;;  %v1979_v59 = vpop.eup %1978  ;;  %1998 = vtanh.f32 %v362_v1 }
 0x107   :  { %1840 = vmatmul.mubr.msk.f32.gmra.mrb[30].mxu1 %vm421_vm1, %v1975_v55  ;;  %v1981_v60 = vpop.eup %1980  ;;  %2000 = vtanh.f32 %v367_v2 }
 0x108   :  { %1842 = vmatprep.mubr.msk.f32.mxu1 %vm421_vm1, %v1973_v53  ;;  %v1983_v63 = vpop.eup %1982  ;;  %2002 = vtanh.f32 %v372_v5 }
 0x109   :  { %v1985_v0 = vpop.eup %1984  ;;  %2004 = vtanh.f32 %v377_v6 }
 0x10a   :  { %v1987_v3 = vpop.eup %1986  ;;  %2006 = vtanh.f32 %v382_v9 }
 0x10b   :  { %1843 = vmatmul.mubr.msk.f32.gmra.mrb[32].mxu1 %vm421_vm1, %v1979_v59  ;;  %v1989_v4 = vpop.eup %1988 }
 0x10c   :  { %1845 = vmatprep.mubr.msk.f32.mxu1 %vm421_vm1, %v1981_v60  ;;  %v1991_v7 = vpop.eup %1990 }
 0x10d   :  { %v1993_v8 = vpop.eup %1992 }
 0x10e   :  { %v1995_v10 = vpop.eup %1994 }
 0x10f   :  { %1846 = vmatmul.mubr.msk.f32.gmra.mrb[34].mxu1 %vm421_vm1, %v1983_v63  ;;  %v1997_v11 = vpop.eup %1996 }
 0x110   :  { %1848 = vmatprep.mubr.msk.f32.mxu1 %vm421_vm1, %v1985_v0  ;;  %v1999_v12 = vpop.eup %1998 }
 0x111   :  { %v2001_v13 = vpop.eup %2000 }
 0x112   :  { %v2003_v14 = vpop.eup %2002 }
 0x113   :  { %1849 = vmatmul.mubr.msk.f32.gmra.mrb[36].mxu1 %vm421_vm1, %v1987_v3  ;;  %v2005_v47 = vpop.eup %2004 }
 0x114   :  { %1851 = vmatprep.mubr.msk.f32.mxu1 %vm421_vm1, %v1989_v4  ;;  %v2007_v15 = vpop.eup %2006 }
 0x117   :  { %1852 = vmatmul.mubr.msk.f32.gmra.mrb[38].mxu1 %vm421_vm1, %v1991_v7 }
 0x118   :  { %1854 = vmatprep.mubr.msk.f32.mxu1 %vm421_vm1, %v1993_v8 }
 0x11b   :  { %1855 = vmatmul.mubr.msk.f32.gmra.mrb[40].mxu1 %vm421_vm1, %v1995_v10 }
 0x11c   :  { %1857 = vmatprep.mubr.msk.f32.mxu1 %vm421_vm1, %v1997_v11 }
 0x11f   :  { %1858 = vmatmul.mubr.msk.f32.gmra.mrb[42].mxu1 %vm421_vm1, %v1999_v12 }
 0x120   :  { %1860 = vmatprep.mubr.msk.f32.mxu1 %vm421_vm1, %v2001_v13 }
 0x123   :  { %1861 = vmatmul.mubr.msk.f32.gmra.mrb[44].mxu1 %vm421_vm1, %v2003_v14 }
 0x124   :  { %1863 = vmatprep.mubr.msk.f32.mxu1 %vm421_vm1, %v2005_v47 }
 0x127   :  { %1864 = vmatmul.mubr.msk.f32.gmra.mrb[46].mxu1 %vm421_vm1, %v2007_v15 }
 0x1be   :  { %v1820_v17 = vpop.f32.mrb[16].mxu1 }
 0x1bf   :  { %v590_v18 = vadd.f32 %v1820_v17, %v2422_v16  ;;  %v584_v19 = vpop.f32.mrb[17].mxu1 }
 0x1c0   :  { %v585_v20 = vadd.f32 %v2422_v16, %v584_v19 }
 0x1c2   :  { %2008 = vtanh.f32 %v585_v20  ;;  %v1823_v21 = vpop.f32.mrb[18].mxu1 }
 0x1c3   :  { %2010 = vtanh.f32 %v590_v18  ;;  %v600_v22 = vadd.f32 %v1823_v21, %v2422_v16  ;;  %v594_v23 = vpop.f32.mrb[19].mxu1 }
 0x1c4   :  { %v595_v24 = vadd.f32 %v2422_v16, %v594_v23 }
 0x1c6   :  { %2012 = vtanh.f32 %v595_v24  ;;  %v1826_v25 = vpop.f32.mrb[20].mxu1 }
 0x1c7   :  { %2014 = vtanh.f32 %v600_v22  ;;  %v610_v26 = vadd.f32 %v1826_v25, %v2422_v16  ;;  %v604_v27 = vpop.f32.mrb[21].mxu1 }
 0x1c8   :  { %v605_v28 = vadd.f32 %v2422_v16, %v604_v27 }
 0x1c9   :  { %2016 = vtanh.f32 %v610_v26 }
 0x1ca   :  { %2018 = vtanh.f32 %v605_v28  ;;  %v1829_v29 = vpop.f32.mrb[22].mxu1 }
 0x1cb   :  { %v620_v30 = vadd.f32 %v1829_v29, %v2422_v16  ;;  %v614_v31 = vpop.f32.mrb[23].mxu1 }
 0x1cc   :  { %v2009_v32 = vpop.eup %2008  ;;  %v615_v33 = vadd.f32 %v2422_v16, %v614_v31 }
 0x1cd   :  { %v2011_v34 = vpop.eup %2010  ;;  %2020 = vtanh.f32 %v620_v30  ;;  %1874 = vmatprep.mubr.msk.f32.mxu0 %vm421_vm1, %v2009_v32 }
 0x1ce   :  { %2022 = vtanh.f32 %v615_v33  ;;  %v1832_v35 = vpop.f32.mrb[24].mxu1  ;;  %1875 = vmatmul.mubr.msk.f32.vlgmr.msra.gmra.mrb[16].mxu0 %vm421_vm1, %v2011_v34 }
 0x1cf   :  { %v630_v36 = vadd.f32 %v1832_v35, %v2422_v16  ;;  %v624_v37 = vpop.f32.mrb[25].mxu1 }
 0x1d0   :  { %v2013_v38 = vpop.eup %2012  ;;  %v625_v39 = vadd.f32 %v2422_v16, %v624_v37 }
 0x1d1   :  { %v2015_v40 = vpop.eup %2014  ;;  %2024 = vtanh.f32 %v630_v36  ;;  %1877 = vmatprep.mubr.msk.f32.mxu0 %vm421_vm1, %v2013_v38 }
 0x1d2   :  { %2026 = vtanh.f32 %v625_v39  ;;  %v1835_v41 = vpop.f32.mrb[26].mxu1  ;;  %1878 = vmatmul.mubr.msk.f32.gmra.mrb[18].mxu0 %vm421_vm1, %v2015_v40 }
 0x1d3   :  { %v2017_v42 = vpop.eup %2016  ;;  %v640_v43 = vadd.f32 %v1835_v41, %v2422_v16  ;;  %v634_v44 = vpop.f32.mrb[27].mxu1 }
 0x1d4   :  { %v2019_v45 = vpop.eup %2018  ;;  %v635_v46 = vadd.f32 %v2422_v16, %v634_v44 }
 0x1d5   :  { %2028 = vtanh.f32 %v640_v43  ;;  %1880 = vmatprep.mubr.msk.f32.mxu0 %vm421_vm1, %v2019_v45 }
 0x1d6   :  { %2030 = vtanh.f32 %v635_v46  ;;  %v1838_v48 = vpop.f32.mrb[28].mxu1  ;;  %1881 = vmatmul.mubr.msk.f32.gmra.mrb[20].mxu0 %vm421_vm1, %v2017_v42 }
 0x1d7   :  { %v2021_v49 = vpop.eup %2020  ;;  %v650_v50 = vadd.f32 %v1838_v48, %v2422_v16  ;;  %v644_v51 = vpop.f32.mrb[29].mxu1 }
 0x1d8   :  { %v2023_v52 = vpop.eup %2022  ;;  %v645_v53 = vadd.f32 %v2422_v16, %v644_v51 }
 0x1d9   :  { %2032 = vtanh.f32 %v650_v50  ;;  %1883 = vmatprep.mubr.msk.f32.mxu0 %vm421_vm1, %v2023_v52  ;;  %v2491_v50 = vld [vmem:[%s2981_s2 + $0x60] ss:$0 sm:$0xff]  ;;  %v1101_v52 = vld [vmem:[%s2983_s1 + $0x8] sm:$0xff] }
 0x1da   :  { %2034 = vtanh.f32 %v645_v53  ;;  %v1841_v54 = vpop.f32.mrb[30].mxu1  ;;  %1884 = vmatmul.mubr.msk.f32.gmra.mrb[22].mxu0 %vm421_vm1, %v2021_v49 }
 0x1db   :  { %v2025_v55 = vpop.eup %2024  ;;  %v660_v56 = vadd.f32 %v1841_v54, %v2422_v16  ;;  %v654_v57 = vpop.f32.mrb[31].mxu1 }
 0x1dc   :  { %v2027_v58 = vpop.eup %2026  ;;  %v655_v59 = vadd.f32 %v2422_v16, %v654_v57 }
 0x1dd   :  { %2036 = vtanh.f32 %v660_v56  ;;  %1886 = vmatprep.mubr.msk.f32.mxu0 %vm421_vm1, %v2027_v58 }
 0x1de   :  { %2038 = vtanh.f32 %v655_v59  ;;  %v1844_v60 = vpop.f32.mrb[32].mxu1  ;;  %1887 = vmatmul.mubr.msk.f32.gmra.mrb[24].mxu0 %vm421_vm1, %v2025_v55  ;;  %v1100_v55 = vld [vmem:[%s2983_s1] sm:$0xff] }
 0x1df   :  { %v2029_v61 = vpop.eup %2028  ;;  %v670_v62 = vadd.f32 %v1844_v60, %v2422_v16  ;;  %v664_v63 = vpop.f32.mrb[33].mxu1  ;;  %v1103_v60 = vld [vmem:[%s2983_s1 + $0x18] sm:$0xff] }
 0x1e0   :  { %v2031_v0 = vpop.eup %2030  ;;  %v665_v1 = vadd.f32 %v2422_v16, %v664_v63  ;;  %v1102_v63 = vld [vmem:[%s2983_s1 + $0x10] sm:$0xff] }
 0x1e1   :  { %2040 = vtanh.f32 %v670_v62  ;;  %1889 = vmatprep.mubr.msk.f32.mxu0 %vm421_vm1, %v2031_v0 }
 0x1e2   :  { %2042 = vtanh.f32 %v665_v1  ;;  %v1847_v2 = vpop.f32.mrb[34].mxu1  ;;  %1890 = vmatmul.mubr.msk.f32.gmra.mrb[26].mxu0 %vm421_vm1, %v2029_v61 }
 0x1e3   :  { %v2033_v3 = vpop.eup %2032  ;;  %v680_v4 = vadd.f32 %v1847_v2, %v2422_v16  ;;  %v674_v5 = vpop.f32.mrb[35].mxu1 }
 0x1e4   :  { %v2035_v6 = vpop.eup %2034  ;;  %v675_v7 = vadd.f32 %v2422_v16, %v674_v5 }
 0x1e5   :  { %2044 = vtanh.f32 %v680_v4  ;;  %1892 = vmatprep.mubr.msk.f32.mxu0 %vm421_vm1, %v2035_v6 }
 0x1e6   :  { %2046 = vtanh.f32 %v675_v7  ;;  %v1850_v8 = vpop.f32.mrb[36].mxu1  ;;  %1893 = vmatmul.mubr.msk.f32.gmra.mrb[28].mxu0 %vm421_vm1, %v2033_v3  ;;  %v1105_v7 = vld [vmem:[%s2983_s1 + $0x28] sm:$0xff] }
 0x1e7   :  { %v2037_v9 = vpop.eup %2036  ;;  %v690_v10 = vadd.f32 %v1850_v8, %v2422_v16  ;;  %v684_v11 = vpop.f32.mrb[37].mxu1 }
 0x1e8   :  { %v2039_v12 = vpop.eup %2038  ;;  %v685_v13 = vadd.f32 %v2422_v16, %v684_v11 }
 0x1e9   :  { %2048 = vtanh.f32 %v690_v10  ;;  %1895 = vmatprep.mubr.msk.f32.mxu0 %vm421_vm1, %v2039_v12  ;;  %v1104_v10 = vld [vmem:[%s2983_s1 + $0x20] sm:$0xff] }
 0x1ea   :  { %2050 = vtanh.f32 %v685_v13  ;;  %v1853_v14 = vpop.f32.mrb[38].mxu1  ;;  %1896 = vmatmul.mubr.msk.f32.gmra.mrb[30].mxu0 %vm421_vm1, %v2037_v9 }
 0x1eb   :  { %v2041_v47 = vpop.eup %2040  ;;  %v700_v15 = vadd.f32 %v1853_v14, %v2422_v16  ;;  %v694_v17 = vpop.f32.mrb[39].mxu1 }
 0x1ec   :  { %v2043_v18 = vpop.eup %2042  ;;  %v695_v19 = vadd.f32 %v2422_v16, %v694_v17 }
 0x1ed   :  { %2052 = vtanh.f32 %v700_v15  ;;  %1898 = vmatprep.mubr.msk.f32.mxu0 %vm421_vm1, %v2043_v18 }
 0x1ee   :  { %2054 = vtanh.f32 %v695_v19  ;;  %v1856_v20 = vpop.f32.mrb[40].mxu1  ;;  %1899 = vmatmul.mubr.msk.f32.gmra.mrb[32].mxu0 %vm421_vm1, %v2041_v47  ;;  %v1107_v19 = vld [vmem:[%s2983_s1 + $0x38] sm:$0xff] }
 0x1ef   :  { %v2045_v21 = vpop.eup %2044  ;;  %v710_v22 = vadd.f32 %v1856_v20, %v2422_v16  ;;  %v704_v23 = vpop.f32.mrb[41].mxu1 }
 0x1f0   :  { %v2047_v24 = vpop.eup %2046  ;;  %v705_v25 = vadd.f32 %v2422_v16, %v704_v23 }
 0x1f1   :  { %2056 = vtanh.f32 %v710_v22  ;;  %1901 = vmatprep.mubr.msk.f32.mxu0 %vm421_vm1, %v2047_v24  ;;  %v1106_v22 = vld [vmem:[%s2983_s1 + $0x30] sm:$0xff] }
 0x1f2   :  { %2058 = vtanh.f32 %v705_v25  ;;  %v1859_v26 = vpop.f32.mrb[42].mxu1  ;;  %1902 = vmatmul.mubr.msk.f32.gmra.mrb[34].mxu0 %vm421_vm1, %v2045_v21 }
 0x1f3   :  { %v2049_v27 = vpop.eup %2048  ;;  %v720_v28 = vadd.f32 %v1859_v26, %v2422_v16  ;;  %v714_v29 = vpop.f32.mrb[43].mxu1 }
 0x1f4   :  { %v2051_v30 = vpop.eup %2050  ;;  %v715_v31 = vadd.f32 %v2422_v16, %v714_v29 }
 0x1f5   :  { %2060 = vtanh.f32 %v720_v28  ;;  %1904 = vmatprep.mubr.msk.f32.mxu0 %vm421_vm1, %v2051_v30  ;;  %v1109_v30 = vld [vmem:[%s2983_s1 + $0x48] sm:$0xff] }
 0x1f6   :  { %2062 = vtanh.f32 %v715_v31  ;;  %v1862_v32 = vpop.f32.mrb[44].mxu1  ;;  %1905 = vmatmul.mubr.msk.f32.gmra.mrb[36].mxu0 %vm421_vm1, %v2049_v27 }
 0x1f7   :  { %v2053_v33 = vpop.eup %2052  ;;  %v730_v34 = vadd.f32 %v1862_v32, %v2422_v16  ;;  %v724_v35 = vpop.f32.mrb[45].mxu1 }
 0x1f8   :  { %v2055_v36 = vpop.eup %2054  ;;  %v725_v37 = vadd.f32 %v2422_v16, %v724_v35 }
 0x1f9   :  { %2064 = vtanh.f32 %v730_v34  ;;  %1907 = vmatprep.mubr.msk.f32.mxu0 %vm421_vm1, %v2055_v36  ;;  %v1108_v34 = vld [vmem:[%s2983_s1 + $0x40] sm:$0xff] }
 0x1fa   :  { %2066 = vtanh.f32 %v725_v37  ;;  %v1865_v38 = vpop.f32.mrb[46].mxu1  ;;  %1908 = vmatmul.mubr.msk.f32.gmra.mrb[38].mxu0 %vm421_vm1, %v2053_v33 }
 0x1fb   :  { %v2057_v39 = vpop.eup %2056  ;;  %v740_v40 = vadd.f32 %v1865_v38, %v2422_v16  ;;  %v734_v41 = vpop.f32.mrb[47].mxu1 }
 0x1fc   :  { %v2059_v42 = vpop.eup %2058  ;;  %v735_v43 = vadd.f32 %v2422_v16, %v734_v41 }
 0x1fd   :  { %2068 = vtanh.f32 %v740_v40  ;;  %1910 = vmatprep.mubr.msk.f32.mxu0 %vm421_vm1, %v2059_v42  ;;  %v1111_v42 = vld [vmem:[%s2983_s1 + $0x58] sm:$0xff] }
 0x1fe   :  { %2070 = vtanh.f32 %v735_v43  ;;  %1911 = vmatmul.mubr.msk.f32.gmra.mrb[40].mxu0 %vm421_vm1, %v2057_v39 }
 0x1ff   :  { %v2061_v44 = vpop.eup %2060 }
 0x200   :  { %v2063_v45 = vpop.eup %2062 }
 0x201   :  { %1913 = vmatprep.mubr.msk.f32.mxu0 %vm421_vm1, %v2063_v45 }
 0x202   :  { %1914 = vmatmul.mubr.msk.f32.gmra.mrb[42].mxu0 %vm421_vm1, %v2061_v44 }
 0x203   :  { %v2065_v46 = vpop.eup %2064 }
 0x204   :  { %v2067_v48 = vpop.eup %2066 }
 0x205   :  { %1916 = vmatprep.mubr.msk.f32.mxu0 %vm421_vm1, %v2067_v48 }
 0x206   :  { %1917 = vmatmul.mubr.msk.f32.gmra.mrb[44].mxu0 %vm421_vm1, %v2065_v46  ;;  %v1110_v46 = vld [vmem:[%s2983_s1 + $0x50] sm:$0xff] }
 0x207   :  { %v2069_v49 = vpop.eup %2068 }
 0x208   :  { %v2071_v16 = vpop.eup %2070 }
 0x209   :  { %1919 = vmatprep.mubr.msk.f32.mxu0 %vm421_vm1, %v2071_v16 }
 0x20a   :  { %1920 = vmatmul.mubr.msk.f32.gmra.mrb[46].mxu0 %vm421_vm1, %v2069_v49 }
 0x2a1   :  { %v1876_v51 = vpop.f32.mrb[16].mxu0 }
 0x2a2   :  { %v947_v53 = vadd.f32 %v1876_v51, %v2491_v50  ;;  %v941_v54 = vpop.f32.mrb[17].mxu0 }
 0x2a3   :  { %v942_v56 = vadd.f32 %v2491_v50, %v941_v54 }
 0x2a4   :  { %v1133_v57 = vsub.f32 %v947_v53, %v1101_v52 }
 0x2a5   :  { %v1132_v58 = vsub.f32 %v942_v56, %v1100_v55  ;;  %v1879_v59 = vpop.f32.mrb[18].mxu0  ;;  %v1113_v55 = vld [vmem:[%s2983_s1 + $0x68] sm:$0xff] }
 0x2a6   :  { %v957_v61 = vadd.f32 %v1879_v59, %v2491_v50  ;;  %v951_v62 = vpop.f32.mrb[19].mxu0  ;;  %v1165_v0 = vmul.f32 %v1133_v57, %v1133_v57  ;;  %v1112_v59 = vld [vmem:[%s2983_s1 + $0x60] sm:$0xff] }
 0x2a7   :  { %v952_v1 = vadd.f32 %v2491_v50, %v951_v62  ;;  %v1164_v4 = vmul.f32 %v1132_v58, %v1132_v58 }
 0x2a8   :  { %v1199_v2 = vsel %vm63_vm0, %v1165_v0, 0.0  ;;  %v1135_v3 = vsub.f32 %v957_v61, %v1103_v60 }
 0x2a9   :  { %v1134_v5 = vsub.f32 %v952_v1, %v1102_v63  ;;  %1200 = vadd.xlane.f32.xlu0 %v1199_v2  ;;  %v1882_v6 = vpop.f32.mrb[20].mxu0  ;;  %v1196_v47 = vsel %vm63_vm0, %v1164_v4, 0.0 }
 0x2aa   :  { %v967_v8 = vadd.f32 %v1882_v6, %v2491_v50  ;;  %v961_v9 = vpop.f32.mrb[21].mxu0  ;;  %v1167_v11 = vmul.f32 %v1135_v3, %v1135_v3  ;;  %v1115_v3 = vld [vmem:[%s2983_s1 + $0x78] sm:$0xff] }
 0x2ab   :  { %v962_v12 = vadd.f32 %v2491_v50, %v961_v9  ;;  %v1166_v15 = vmul.f32 %v1134_v5, %v1134_v5 }
 0x2ac   :  { %v1137_v13 = vsub.f32 %v967_v8, %v1105_v7  ;;  %v1205_v14 = vsel %vm63_vm0, %v1167_v11, 0.0  ;;  %v1114_v7 = vld [vmem:[%s2983_s1 + $0x70] sm:$0xff] }
 0x2ad   :  { %v1136_v17 = vsub.f32 %v962_v12, %v1104_v10  ;;  %1206 = vadd.xlane.f32.xlu1 %v1205_v14  ;;  %v1885_v18 = vpop.f32.mrb[22].mxu0  ;;  %1197 = vadd.xlane.f32.xlu0 %v1196_v47  ;;  %v1202_v26 = vsel %vm63_vm0, %v1166_v15, 0.0  ;;  %v1117_v47 = vld [vmem:[%s2983_s1 + $0x88] sm:$0xff] }
 0x2ae   :  { %v977_v20 = vadd.f32 %v1885_v18, %v2491_v50  ;;  %v971_v21 = vpop.f32.mrb[23].mxu0  ;;  %v1169_v27 = vmul.f32 %v1137_v13, %v1137_v13 }
 0x2af   :  { %v972_v23 = vadd.f32 %v2491_v50, %v971_v21  ;;  %v1168_v24 = vmul.f32 %v1136_v17, %v1136_v17 }
 0x2b0   :  { %v1139_v25 = vsub.f32 %v977_v20, %v1107_v19  ;;  %v1211_v38 = vsel %vm63_vm0, %v1169_v27, 0.0  ;;  %v1116_v19 = vld [vmem:[%s2983_s1 + $0x80] sm:$0xff]  ;;  %v1119_v27 = vld [vmem:[%s2983_s1 + $0x98] sm:$0xff] }
 0x2b1   :  { %v1138_v28 = vsub.f32 %v972_v23, %v1106_v22  ;;  %v1888_v29 = vpop.f32.mrb[24].mxu0  ;;  %1203 = vadd.xlane.f32.xlu1 %v1202_v26  ;;  %v1208_v31 = vsel %vm63_vm0, %v1168_v24, 0.0 }
 0x2b2   :  { %v987_v32 = vadd.f32 %v1888_v29, %v2491_v50  ;;  %v981_v33 = vpop.f32.mrb[25].mxu0  ;;  %1209 = vadd.xlane.f32.xlu0 %v1208_v31  ;;  %v1171_v39 = vmul.f32 %v1139_v25, %v1139_v25  ;;  %v1118_v31 = vld [vmem:[%s2983_s1 + $0x90] sm:$0xff] }
 0x2b3   :  { %v982_v35 = vadd.f32 %v2491_v50, %v981_v33  ;;  %v1170_v36 = vmul.f32 %v1138_v28, %v1138_v28 }
 0x2b4   :  { %v1141_v37 = vsub.f32 %v987_v32, %v1109_v30  ;;  %v1217_v51 = vsel %vm63_vm0, %v1171_v39, 0.0  ;;  %v1121_v39 = vld [vmem:[%s2983_s1 + $0xa8] sm:$0xff] }
 0x2b5   :  { %v1140_v40 = vsub.f32 %v982_v35, %v1108_v34  ;;  %v1891_v41 = vpop.f32.mrb[26].mxu0  ;;  %1212 = vadd.xlane.f32.xlu1 %v1211_v38  ;;  %v1214_v43 = vsel %vm63_vm0, %v1170_v36, 0.0 }
 0x2b6   :  { %v997_v44 = vadd.f32 %v1891_v41, %v2491_v50  ;;  %v991_v45 = vpop.f32.mrb[27].mxu0  ;;  %1215 = vadd.xlane.f32.xlu0 %v1214_v43  ;;  %v1173_v52 = vmul.f32 %v1141_v37, %v1141_v37  ;;  %v1120_v43 = vld [vmem:[%s2983_s1 + $0xa0] sm:$0xff] }
 0x2b7   :  { %v992_v48 = vadd.f32 %v2491_v50, %v991_v45  ;;  %v1172_v49 = vmul.f32 %v1140_v40, %v1140_v40 }
 0x2b8   :  { %v1143_v16 = vsub.f32 %v997_v44, %v1111_v42  ;;  %v1223_v63 = vsel %vm63_vm0, %v1173_v52, 0.0  ;;  %v1123_v52 = vld [vmem:[%s2983_s1 + $0xb8] sm:$0xff] }
 0x2b9   :  { %v1142_v53 = vsub.f32 %v992_v48, %v1110_v46  ;;  %v1894_v54 = vpop.f32.mrb[28].mxu0  ;;  %1218 = vadd.xlane.f32.xlu1 %v1217_v51  ;;  %v1220_v56 = vsel %vm63_vm0, %v1172_v49, 0.0 }
 0x2ba   :  { %v1007_v57 = vadd.f32 %v1894_v54, %v2491_v50  ;;  %v1001_v58 = vpop.f32.mrb[29].mxu0  ;;  %1221 = vadd.xlane.f32.xlu0 %v1220_v56  ;;  %v1175_v0 = vmul.f32 %v1143_v16, %v1143_v16  ;;  %v1122_v56 = vld [vmem:[%s2983_s1 + $0xb0] sm:$0xff] }
 0x2bb   :  { %v1002_v60 = vadd.f32 %v2491_v50, %v1001_v58  ;;  %v1174_v61 = vmul.f32 %v1142_v53, %v1142_v53 }
 0x2bc   :  { %v1145_v62 = vsub.f32 %v1007_v57, %v1113_v55  ;;  %v1229_v11 = vsel %vm63_vm0, %v1175_v0, 0.0  ;;  %v1125_v0 = vld [vmem:[%s2983_s1 + $0xc8] sm:$0xff] }
 0x2bd   :  { %v1144_v1 = vsub.f32 %v1002_v60, %v1112_v59  ;;  %v1897_v2 = vpop.f32.mrb[30].mxu0  ;;  %1224 = vadd.xlane.f32.xlu1 %v1223_v63  ;;  %v1226_v4 = vsel %vm63_vm0, %v1174_v61, 0.0 }
 0x2be   :  { %v1017_v5 = vadd.f32 %v1897_v2, %v2491_v50  ;;  %v1011_v6 = vpop.f32.mrb[31].mxu0  ;;  %1227 = vadd.xlane.f32.xlu0 %v1226_v4  ;;  %v1177_v12 = vmul.f32 %v1145_v62, %v1145_v62  ;;  %v1124_v4 = vld [vmem:[%s2983_s1 + $0xc0] sm:$0xff] }
 0x2bf   :  { %v1012_v8 = vadd.f32 %v2491_v50, %v1011_v6  ;;  %v1176_v9 = vmul.f32 %v1144_v1, %v1144_v1 }
 0x2c0   :  { %v1147_v10 = vsub.f32 %v1017_v5, %v1115_v3  ;;  %v1235_v23 = vsel %vm63_vm0, %v1177_v12, 0.0  ;;  %v1127_v12 = vld [vmem:[%s2983_s1 + $0xd8] sm:$0xff] }
 0x2c1   :  { %v1146_v13 = vsub.f32 %v1012_v8, %v1114_v7  ;;  %v1900_v14 = vpop.f32.mrb[32].mxu0  ;;  %1230 = vadd.xlane.f32.xlu1 %v1229_v11  ;;  %v1232_v15 = vsel %vm63_vm0, %v1176_v9, 0.0 }
 0x2c2   :  { %v1027_v17 = vadd.f32 %v1900_v14, %v2491_v50  ;;  %v1021_v18 = vpop.f32.mrb[33].mxu0  ;;  %1233 = vadd.xlane.f32.xlu0 %v1232_v15  ;;  %v1179_v24 = vmul.f32 %v1147_v10, %v1147_v10  ;;  %v1126_v15 = vld [vmem:[%s2983_s1 + $0xd0] sm:$0xff] }
 0x2c3   :  { %v1022_v20 = vadd.f32 %v2491_v50, %v1021_v18  ;;  %v1178_v21 = vmul.f32 %v1146_v13, %v1146_v13 }
 0x2c4   :  { %v1149_v22 = vsub.f32 %v1027_v17, %v1117_v47  ;;  %v1241_v35 = vsel %vm63_vm0, %v1179_v24, 0.0  ;;  %v1129_v24 = vld [vmem:[%s2983_s1 + $0xe8] sm:$0xff] }
 0x2c5   :  { %v1148_v25 = vsub.f32 %v1022_v20, %v1116_v19  ;;  %v1903_v26 = vpop.f32.mrb[34].mxu0  ;;  %1236 = vadd.xlane.f32.xlu1 %v1235_v23  ;;  %v1238_v28 = vsel %vm63_vm0, %v1178_v21, 0.0 }
 0x2c6   :  { %v1037_v29 = vadd.f32 %v1903_v26, %v2491_v50  ;;  %v1031_v30 = vpop.f32.mrb[35].mxu0  ;;  %1239 = vadd.xlane.f32.xlu0 %v1238_v28  ;;  %v1181_v36 = vmul.f32 %v1149_v22, %v1149_v22  ;;  %v1128_v28 = vld [vmem:[%s2983_s1 + $0xe0] sm:$0xff] }
 0x2c7   :  { %v1032_v32 = vadd.f32 %v2491_v50, %v1031_v30  ;;  %v1180_v33 = vmul.f32 %v1148_v25, %v1148_v25 }
 0x2c8   :  { %v1151_v34 = vsub.f32 %v1037_v29, %v1119_v27  ;;  %v1247_v48 = vsel %vm63_vm0, %v1181_v36, 0.0  ;;  %v1131_v36 = vld [vmem:[%s2983_s1 + $0xf8] sm:$0xff] }
 0x2c9   :  { %v1150_v37 = vsub.f32 %v1032_v32, %v1118_v31  ;;  %v1906_v38 = vpop.f32.mrb[36].mxu0  ;;  %1242 = vadd.xlane.f32.xlu1 %v1241_v35  ;;  %v1244_v40 = vsel %vm63_vm0, %v1180_v33, 0.0 }
 0x2ca   :  { %v1047_v41 = vadd.f32 %v1906_v38, %v2491_v50  ;;  %v1041_v42 = vpop.f32.mrb[37].mxu0  ;;  %1245 = vadd.xlane.f32.xlu0 %v1244_v40  ;;  %v1183_v49 = vmul.f32 %v1151_v34, %v1151_v34  ;;  %v1130_v40 = vld [vmem:[%s2983_s1 + $0xf0] sm:$0xff] }
 0x2cb   :  { %v1042_v44 = vadd.f32 %v2491_v50, %v1041_v42  ;;  %v1182_v45 = vmul.f32 %v1150_v37, %v1150_v37 }
 0x2cc   :  { %v1153_v46 = vsub.f32 %v1047_v41, %v1121_v39  ;;  %v1253_v60 = vsel %vm63_vm0, %v1183_v49, 0.0 }
 0x2cd   :  { %v1152_v16 = vsub.f32 %v1042_v44, %v1120_v43  ;;  %v1909_v51 = vpop.f32.mrb[38].mxu0  ;;  %1248 = vadd.xlane.f32.xlu1 %v1247_v48  ;;  %v1250_v53 = vsel %vm63_vm0, %v1182_v45, 0.0 }
 0x2ce   :  { %v1057_v54 = vadd.f32 %v1909_v51, %v2491_v50  ;;  %v1051_v55 = vpop.f32.mrb[39].mxu0  ;;  %1251 = vadd.xlane.f32.xlu0 %v1250_v53  ;;  %v1185_v61 = vmul.f32 %v1153_v46, %v1153_v46 }
 0x2cf   :  { %v1052_v57 = vadd.f32 %v2491_v50, %v1051_v55  ;;  %v1184_v58 = vmul.f32 %v1152_v16, %v1152_v16 }
 0x2d0   :  { %v1155_v59 = vsub.f32 %v1057_v54, %v1123_v52  ;;  %v1259_v8 = vsel %vm63_vm0, %v1185_v61, 0.0 }
 0x2d1   :  { %v1154_v62 = vsub.f32 %v1052_v57, %v1122_v56  ;;  %v1912_v63 = vpop.f32.mrb[40].mxu0  ;;  %1254 = vadd.xlane.f32.xlu1 %v1253_v60  ;;  %v1256_v1 = vsel %vm63_vm0, %v1184_v58, 0.0 }
 0x2d2   :  { %v1067_v2 = vadd.f32 %v1912_v63, %v2491_v50  ;;  %v1061_v3 = vpop.f32.mrb[41].mxu0  ;;  %1257 = vadd.xlane.f32.xlu0 %v1256_v1  ;;  %v1187_v9 = vmul.f32 %v1155_v59, %v1155_v59 }
 0x2d3   :  { %v1062_v5 = vadd.f32 %v2491_v50, %v1061_v3  ;;  %v1186_v6 = vmul.f32 %v1154_v62, %v1154_v62 }
 0x2d4   :  { %v1157_v7 = vsub.f32 %v1067_v2, %v1125_v0  ;;  %v1265_v20 = vsel %vm63_vm0, %v1187_v9, 0.0 }
 0x2d5   :  { %v1156_v10 = vsub.f32 %v1062_v5, %v1124_v4  ;;  %v1915_v11 = vpop.f32.mrb[42].mxu0  ;;  %1260 = vadd.xlane.f32.xlu1 %v1259_v8  ;;  %v1262_v13 = vsel %vm63_vm0, %v1186_v6, 0.0 }
 0x2d6   :  { %v1077_v14 = vadd.f32 %v1915_v11, %v2491_v50  ;;  %v1071_v47 = vpop.f32.mrb[43].mxu0  ;;  %1263 = vadd.xlane.f32.xlu0 %v1262_v13  ;;  %v1189_v21 = vmul.f32 %v1157_v7, %v1157_v7 }
 0x2d7   :  { %v1072_v17 = vadd.f32 %v2491_v50, %v1071_v47  ;;  %v1188_v18 = vmul.f32 %v1156_v10, %v1156_v10 }
 0x2d8   :  { %v1159_v19 = vsub.f32 %v1077_v14, %v1127_v12  ;;  %v1271_v32 = vsel %vm63_vm0, %v1189_v21, 0.0 }
 0x2d9   :  { %v1158_v22 = vsub.f32 %v1072_v17, %v1126_v15  ;;  %v1918_v23 = vpop.f32.mrb[44].mxu0  ;;  %1266 = vadd.xlane.f32.xlu1 %v1265_v20  ;;  %v1268_v25 = vsel %vm63_vm0, %v1188_v18, 0.0 }
 0x2da   :  { %v1087_v26 = vadd.f32 %v1918_v23, %v2491_v50  ;;  %v1081_v27 = vpop.f32.mrb[45].mxu0  ;;  %1269 = vadd.xlane.f32.xlu0 %v1268_v25  ;;  %v1191_v33 = vmul.f32 %v1159_v19, %v1159_v19 }
 0x2db   :  { %v1082_v29 = vadd.f32 %v2491_v50, %v1081_v27  ;;  %v1190_v30 = vmul.f32 %v1158_v22, %v1158_v22 }
 0x2dc   :  { %v1161_v31 = vsub.f32 %v1087_v26, %v1129_v24  ;;  %v1277_v44 = vsel %vm63_vm0, %v1191_v33, 0.0 }
 0x2dd   :  { %v1160_v34 = vsub.f32 %v1082_v29, %v1128_v28  ;;  %v1921_v35 = vpop.f32.mrb[46].mxu0  ;;  %1272 = vadd.xlane.f32.xlu1 %v1271_v32  ;;  %v1274_v37 = vsel %vm63_vm0, %v1190_v30, 0.0 }
 0x2de   :  { %v1097_v38 = vadd.f32 %v1921_v35, %v2491_v50  ;;  %v1091_v39 = vpop.f32.mrb[47].mxu0  ;;  %1275 = vadd.xlane.f32.xlu0 %v1274_v37  ;;  %v1193_v45 = vmul.f32 %v1161_v31, %v1161_v31 }
 0x2df   :  { %v1092_v41 = vadd.f32 %v2491_v50, %v1091_v39  ;;  %v1192_v42 = vmul.f32 %v1160_v34, %v1160_v34 }
 0x2e0   :  { %v1163_v43 = vsub.f32 %v1097_v38, %v1131_v36  ;;  %v1283_v16 = vsel %vm63_vm0, %v1193_v45, 0.0 }
 0x2e1   :  { %v1162_v46 = vsub.f32 %v1092_v41, %v1130_v40  ;;  %1278 = vadd.xlane.f32.xlu1 %v1277_v44  ;;  %v1280_v48 = vsel %vm63_vm0, %v1192_v42, 0.0 }
 0x2e2   :  { %1281 = vadd.xlane.f32.xlu0 %v1280_v48  ;;  %v1195_v51 = vmul.f32 %v1163_v43, %v1163_v43 }
 0x2e3   :  { %v1194_v49 = vmul.f32 %v1162_v46, %v1162_v46 }
 0x2e4   :  { %v1289_v50 = vsel %vm63_vm0, %v1195_v51, 0.0 }
 0x2e5   :  { %1284 = vadd.xlane.f32.xlu1 %v1283_v16  ;;  %v1286_v52 = vsel %vm63_vm0, %v1194_v49, 0.0 }
 0x2e6   :  { %1287 = vadd.xlane.f32.xlu0 %v1286_v52 }
 0x2e9   :  { %1290 = vadd.xlane.f32.xlu1 %v1289_v50 }
 0x336   :  { %v1201_v53 = vpop.xlane.xlu0 %1200 }
 0x337   :  { %2072 = vrsqrt.f32 %v1201_v53  ;;  %vm1301_vm3 = vcmp.eq.f32.partialorder %v1201_v53, inf  ;;  %v1304_v61 = vand.u32 2147483648, %v1201_v53  ;;  %vm1303_vm4 = vcmp.eq.f32.partialorder %v1201_v53, 0.0 }
 0x33a   :  { %v1207_v54 = vpop.xlane.xlu1 %1206  ;;  %v1198_v55 = vpop.xlane.xlu0 %1197 }
 0x33b   :  { %2074 = vrsqrt.f32 %v1207_v54  ;;  %vm1315_vm5 = vcmp.eq.f32.partialorder %v1207_v54, inf  ;;  %vm1317_vm6 = vcmp.eq.f32.partialorder %v1207_v54, 0.0  ;;  %v1318_v5 = vand.u32 2147483648, %v1207_v54 }
 0x33c   :  { %2076 = vrsqrt.f32 %v1198_v55  ;;  %vm1294_vm7 = vcmp.eq.f32.partialorder %v1198_v55, inf  ;;  %v1297_v9 = vand.u32 2147483648, %v1198_v55  ;;  %vm1296_vm8 = vcmp.eq.f32.partialorder %v1198_v55, 0.0 }
 0x33e   :  { %v1204_v56 = vpop.xlane.xlu1 %1203 }
 0x33f   :  { %2078 = vrsqrt.f32 %v1204_v56  ;;  %v1210_v57 = vpop.xlane.xlu0 %1209  ;;  %vm1308_vm9 = vcmp.eq.f32.partialorder %v1204_v56, inf  ;;  %vm1310_vm10 = vcmp.eq.f32.partialorder %v1204_v56, 0.0  ;;  %v1311_v17 = vand.u32 2147483648, %v1204_v56 }
 0x340   :  { %2080 = vrsqrt.f32 %v1210_v57  ;;  %vm1322_vm11 = vcmp.eq.f32.partialorder %v1210_v57, inf  ;;  %v1325_v21 = vand.u32 2147483648, %v1210_v57  ;;  %vm1324_vm12 = vcmp.eq.f32.partialorder %v1210_v57, 0.0 }
 0x341   :  { %v2073_v58 = vpop.eup %2072 }
 0x342   :  { %v1300_v59 = vmul.f32 %v2073_v58, %v1201_v53  ;;  %v2653_v60 = vpop.xlane.xlu1 %1212 }
 0x343   :  { %2082 = vrsqrt.f32 %v2653_v60  ;;  %v2656_v62 = vpop.xlane.xlu0 %1215  ;;  %vm1329_vm13 = vcmp.eq.f32.partialorder %v2653_v60, inf  ;;  %vm1331_vm14 = vcmp.eq.f32.partialorder %v2653_v60, 0.0  ;;  %v1332_v29 = vand.u32 2147483648, %v2653_v60 }
 0x344   :  { %v1302_v63 = vsel %vm1301_vm3, %v1201_v53, %v1300_v59  ;;  %2084 = vrsqrt.f32 %v2656_v62  ;;  %vm1336_vm15 = vcmp.eq.f32.partialorder %v2656_v62, inf  ;;  %v1339_v33 = vand.u32 2147483648, %v2656_v62 }
 0x345   :  { %v2075_v0 = vpop.eup %2074  ;;  %v1305_v1 = vsel %vm1303_vm4, %v1304_v61, %v1302_v63  ;;  %vm1338_vm0 = vcmp.eq.f32.partialorder %v2656_v62, 0.0 }
 0x346   :  { %v2077_v2 = vpop.eup %2076  ;;  %1518 = vst.msk [vmem:[%s2984_s3 + $0x8] sm:$0xff] %vm1516_vm2, %v1305_v1  ;;  %v1314_v3 = vmul.f32 %v2075_v0, %v1207_v54  ;;  %v2663_v4 = vpop.xlane.xlu1 %1218 }
 0x347   :  { %v1293_v6 = vmul.f32 %v2077_v2, %v1198_v55  ;;  %2086 = vrsqrt.f32 %v2663_v4  ;;  %v2666_v7 = vpop.xlane.xlu0 %1221  ;;  %vm1343_vm1 = vcmp.eq.f32.partialorder %v2663_v4, inf  ;;  %vm1345_vm3 = vcmp.eq.f32.partialorder %v2663_v4, 0.0 }
 0x348   :  { %v1316_v8 = vsel %vm1315_vm5, %v1207_v54, %v1314_v3  ;;  %2088 = vrsqrt.f32 %v2666_v7  ;;  %v1346_v41 = vand.u32 2147483648, %v2663_v4  ;;  %vm1350_vm4 = vcmp.eq.f32.partialorder %v2666_v7, inf }
 0x349   :  { %v2079_v10 = vpop.eup %2078  ;;  %v1319_v11 = vsel %vm1317_vm6, %v1318_v5, %v1316_v8  ;;  %v1295_v12 = vsel %vm1294_vm7, %v1198_v55, %v1293_v6  ;;  %v1353_v45 = vand.u32 2147483648, %v2666_v7  ;;  %vm1352_vm5 = vcmp.eq.f32.partialorder %v2666_v7, 0.0 }
 0x34a   :  { %v2081_v13 = vpop.eup %2080  ;;  %1520 = vst.msk [vmem:[%s2984_s3 + $0x18] sm:$0xff] %vm1516_vm2, %v1319_v11  ;;  %v1298_v14 = vsel %vm1296_vm8, %v1297_v9, %v1295_v12  ;;  %v1307_v47 = vmul.f32 %v2079_v10, %v1204_v56  ;;  %v2673_v15 = vpop.xlane.xlu1 %1224 }
 0x34b   :  { %1517 = vst.msk [vmem:[%s2984_s3] sm:$0xff] %vm1516_vm2, %v1298_v14  ;;  %v1321_v18 = vmul.f32 %v2081_v13, %v1210_v57  ;;  %2090 = vrsqrt.f32 %v2673_v15  ;;  %v2680_v19 = vpop.xlane.xlu0 %1227  ;;  %vm1357_vm6 = vcmp.eq.f32.partialorder %v2673_v15, inf  ;;  %vm1359_vm7 = vcmp.eq.f32.partialorder %v2673_v15, 0.0 }
 0x34c   :  { %v1309_v20 = vsel %vm1308_vm9, %v1204_v56, %v1307_v47  ;;  %2092 = vrsqrt.f32 %v2680_v19  ;;  %v1360_v53 = vand.u32 2147483648, %v2673_v15  ;;  %vm1364_vm8 = vcmp.eq.f32.partialorder %v2680_v19, inf }
 0x34d   :  { %v2083_v22 = vpop.eup %2082  ;;  %v1312_v23 = vsel %vm1310_vm10, %v1311_v17, %v1309_v20  ;;  %v1323_v24 = vsel %vm1322_vm11, %v1210_v57, %v1321_v18  ;;  %v1367_v57 = vand.u32 2147483648, %v2680_v19  ;;  %vm1366_vm9 = vcmp.eq.f32.partialorder %v2680_v19, 0.0 }
 0x34e   :  { %v2085_v25 = vpop.eup %2084  ;;  %1519 = vst.msk [vmem:[%s2984_s3 + $0x10] sm:$0xff] %vm1516_vm2, %v1312_v23  ;;  %v1326_v26 = vsel %vm1324_vm12, %v1325_v21, %v1323_v24  ;;  %v1328_v27 = vmul.f32 %v2083_v22, %v2653_v60  ;;  %v2689_v28 = vpop.xlane.xlu1 %1230 }
 0x34f   :  { %1521 = vst.msk [vmem:[%s2984_s3 + $0x20] sm:$0xff] %vm1516_vm2, %v1326_v26  ;;  %v1335_v30 = vmul.f32 %v2085_v25, %v2656_v62  ;;  %2094 = vrsqrt.f32 %v2689_v28  ;;  %v2699_v31 = vpop.xlane.xlu0 %1233  ;;  %vm1371_vm10 = vcmp.eq.f32.partialorder %v2689_v28, inf  ;;  %vm1373_vm11 = vcmp.eq.f32.partialorder %v2689_v28, 0.0 }
 0x350   :  { %v1330_v32 = vsel %vm1329_vm13, %v2653_v60, %v1328_v27  ;;  %2096 = vrsqrt.f32 %v2699_v31  ;;  %v1374_v1 = vand.u32 2147483648, %v2689_v28  ;;  %vm1378_vm12 = vcmp.eq.f32.partialorder %v2699_v31, inf }
 0x351   :  { %v2087_v34 = vpop.eup %2086  ;;  %v1333_v35 = vsel %vm1331_vm14, %v1332_v29, %v1330_v32  ;;  %v1337_v36 = vsel %vm1336_vm15, %v2656_v62, %v1335_v30  ;;  %v1381_v5 = vand.u32 2147483648, %v2699_v31  ;;  %vm1380_vm13 = vcmp.eq.f32.partialorder %v2699_v31, 0.0 }
 0x352   :  { %v2089_v37 = vpop.eup %2088  ;;  %1522 = vst.msk [vmem:[%s2984_s3 + $0x28] sm:$0xff] %vm1516_vm2, %v1333_v35  ;;  %v1340_v38 = vsel %vm1338_vm0, %v1339_v33, %v1337_v36  ;;  %v1342_v39 = vmul.f32 %v2087_v34, %v2663_v4  ;;  %v2713_v40 = vpop.xlane.xlu1 %1236 }
 0x353   :  { %1523 = vst.msk [vmem:[%s2984_s3 + $0x30] sm:$0xff] %vm1516_vm2, %v1340_v38  ;;  %v1349_v42 = vmul.f32 %v2089_v37, %v2666_v7  ;;  %2098 = vrsqrt.f32 %v2713_v40  ;;  %v2723_v43 = vpop.xlane.xlu0 %1239  ;;  %vm1385_vm14 = vcmp.eq.f32.partialorder %v2713_v40, inf  ;;  %vm1387_vm15 = vcmp.eq.f32.partialorder %v2713_v40, 0.0 }
 0x354   :  { %v1344_v44 = vsel %vm1343_vm1, %v2663_v4, %v1342_v39  ;;  %2100 = vrsqrt.f32 %v2723_v43  ;;  %v1388_v13 = vand.u32 2147483648, %v2713_v40  ;;  %vm1392_vm0 = vcmp.eq.f32.partialorder %v2723_v43, inf }
 0x355   :  { %v2091_v46 = vpop.eup %2090  ;;  %v1347_v48 = vsel %vm1345_vm3, %v1346_v41, %v1344_v44  ;;  %v1351_v49 = vsel %vm1350_vm4, %v2666_v7, %v1349_v42  ;;  %v1395_v17 = vand.u32 2147483648, %v2723_v43  ;;  %vm1394_vm1 = vcmp.eq.f32.partialorder %v2723_v43, 0.0 }
 0x356   :  { %v2093_v16 = vpop.eup %2092  ;;  %1524 = vst.msk [vmem:[%s2984_s3 + $0x38] sm:$0xff] %vm1516_vm2, %v1347_v48  ;;  %v1354_v51 = vsel %vm1352_vm5, %v1353_v45, %v1351_v49  ;;  %v1356_v52 = vmul.f32 %v2091_v46, %v2673_v15  ;;  %v2737_v50 = vpop.xlane.xlu1 %1242 }
 0x357   :  { %1525 = vst.msk [vmem:[%s2984_s3 + $0x40] sm:$0xff] %vm1516_vm2, %v1354_v51  ;;  %v1363_v54 = vmul.f32 %v2093_v16, %v2680_v19  ;;  %2102 = vrsqrt.f32 %v2737_v50  ;;  %v2747_v55 = vpop.xlane.xlu0 %1245  ;;  %vm1399_vm3 = vcmp.eq.f32.partialorder %v2737_v50, inf  ;;  %vm1401_vm4 = vcmp.eq.f32.partialorder %v2737_v50, 0.0 }
 0x358   :  { %v1358_v56 = vsel %vm1357_vm6, %v2673_v15, %v1356_v52  ;;  %2104 = vrsqrt.f32 %v2747_v55  ;;  %v1402_v25 = vand.u32 2147483648, %v2737_v50  ;;  %vm1406_vm5 = vcmp.eq.f32.partialorder %v2747_v55, inf }
 0x359   :  { %v2095_v58 = vpop.eup %2094  ;;  %v1361_v59 = vsel %vm1359_vm7, %v1360_v53, %v1358_v56  ;;  %v1365_v60 = vsel %vm1364_vm8, %v2680_v19, %v1363_v54  ;;  %v1409_v29 = vand.u32 2147483648, %v2747_v55  ;;  %vm1408_vm6 = vcmp.eq.f32.partialorder %v2747_v55, 0.0 }
 0x35a   :  { %v2097_v61 = vpop.eup %2096  ;;  %1526 = vst.msk [vmem:[%s2984_s3 + $0x48] sm:$0xff] %vm1516_vm2, %v1361_v59  ;;  %v1368_v62 = vsel %vm1366_vm9, %v1367_v57, %v1365_v60  ;;  %v1370_v63 = vmul.f32 %v2095_v58, %v2689_v28  ;;  %v2761_v0 = vpop.xlane.xlu1 %1248 }
 0x35b   :  { %1527 = vst.msk [vmem:[%s2984_s3 + $0x50] sm:$0xff] %vm1516_vm2, %v1368_v62  ;;  %v1377_v2 = vmul.f32 %v2097_v61, %v2699_v31  ;;  %2106 = vrsqrt.f32 %v2761_v0  ;;  %v2771_v3 = vpop.xlane.xlu0 %1251  ;;  %vm1413_vm7 = vcmp.eq.f32.partialorder %v2761_v0, inf  ;;  %vm1415_vm8 = vcmp.eq.f32.partialorder %v2761_v0, 0.0 }
 0x35c   :  { %v1372_v4 = vsel %vm1371_vm10, %v2689_v28, %v1370_v63  ;;  %2108 = vrsqrt.f32 %v2771_v3  ;;  %v1416_v37 = vand.u32 2147483648, %v2761_v0  ;;  %vm1420_vm9 = vcmp.eq.f32.partialorder %v2771_v3, inf }
 0x35d   :  { %v2099_v6 = vpop.eup %2098  ;;  %v1375_v7 = vsel %vm1373_vm11, %v1374_v1, %v1372_v4  ;;  %v1379_v8 = vsel %vm1378_vm12, %v2699_v31, %v1377_v2  ;;  %v1423_v41 = vand.u32 2147483648, %v2771_v3  ;;  %vm1422_vm10 = vcmp.eq.f32.partialorder %v2771_v3, 0.0 }
 0x35e   :  { %v2101_v9 = vpop.eup %2100  ;;  %1528 = vst.msk [vmem:[%s2984_s3 + $0x58] sm:$0xff] %vm1516_vm2, %v1375_v7  ;;  %v1382_v10 = vsel %vm1380_vm13, %v1381_v5, %v1379_v8  ;;  %v1384_v11 = vmul.f32 %v2099_v6, %v2713_v40  ;;  %v2785_v12 = vpop.xlane.xlu1 %1254 }
 0x35f   :  { %1529 = vst.msk [vmem:[%s2984_s3 + $0x60] sm:$0xff] %vm1516_vm2, %v1382_v10  ;;  %v1391_v14 = vmul.f32 %v2101_v9, %v2723_v43  ;;  %2110 = vrsqrt.f32 %v2785_v12  ;;  %v2795_v47 = vpop.xlane.xlu0 %1257  ;;  %vm1427_vm11 = vcmp.eq.f32.partialorder %v2785_v12, inf  ;;  %vm1429_vm12 = vcmp.eq.f32.partialorder %v2785_v12, 0.0 }
 0x360   :  { %v1386_v15 = vsel %vm1385_vm14, %v2713_v40, %v1384_v11  ;;  %2112 = vrsqrt.f32 %v2795_v47  ;;  %v1430_v16 = vand.u32 2147483648, %v2785_v12  ;;  %vm1434_vm13 = vcmp.eq.f32.partialorder %v2795_v47, inf }
 0x361   :  { %v2103_v18 = vpop.eup %2102  ;;  %v1389_v19 = vsel %vm1387_vm15, %v1388_v13, %v1386_v15  ;;  %v1393_v20 = vsel %vm1392_vm0, %v2723_v43, %v1391_v14  ;;  %v1437_v53 = vand.u32 2147483648, %v2795_v47  ;;  %vm1436_vm14 = vcmp.eq.f32.partialorder %v2795_v47, 0.0 }
 0x362   :  { %v2105_v21 = vpop.eup %2104  ;;  %1530 = vst.msk [vmem:[%s2984_s3 + $0x68] sm:$0xff] %vm1516_vm2, %v1389_v19  ;;  %v1396_v22 = vsel %vm1394_vm1, %v1395_v17, %v1393_v20  ;;  %v1398_v23 = vmul.f32 %v2103_v18, %v2737_v50  ;;  %v2809_v24 = vpop.xlane.xlu1 %1260 }
 0x363   :  { %1531 = vst.msk [vmem:[%s2984_s3 + $0x70] sm:$0xff] %vm1516_vm2, %v1396_v22  ;;  %v1405_v26 = vmul.f32 %v2105_v21, %v2747_v55  ;;  %2114 = vrsqrt.f32 %v2809_v24  ;;  %v2819_v27 = vpop.xlane.xlu0 %1263  ;;  %vm1441_vm15 = vcmp.eq.f32.partialorder %v2809_v24, inf  ;;  %vm1443_vm0 = vcmp.eq.f32.partialorder %v2809_v24, 0.0 }
 0x364   :  { %v1400_v28 = vsel %vm1399_vm3, %v2737_v50, %v1398_v23  ;;  %2116 = vrsqrt.f32 %v2819_v27  ;;  %v1444_v61 = vand.u32 2147483648, %v2809_v24  ;;  %vm1448_vm1 = vcmp.eq.f32.partialorder %v2819_v27, inf }
 0x365   :  { %v2107_v30 = vpop.eup %2106  ;;  %v1403_v31 = vsel %vm1401_vm4, %v1402_v25, %v1400_v28  ;;  %v1407_v32 = vsel %vm1406_vm5, %v2747_v55, %v1405_v26  ;;  %v1451_v1 = vand.u32 2147483648, %v2819_v27  ;;  %vm1450_vm3 = vcmp.eq.f32.partialorder %v2819_v27, 0.0 }
 0x366   :  { %v2109_v33 = vpop.eup %2108  ;;  %1532 = vst.msk [vmem:[%s2984_s3 + $0x78] sm:$0xff] %vm1516_vm2, %v1403_v31  ;;  %v1410_v34 = vsel %vm1408_vm6, %v1409_v29, %v1407_v32  ;;  %v1412_v35 = vmul.f32 %v2107_v30, %v2761_v0  ;;  %v2833_v36 = vpop.xlane.xlu1 %1266 }
 0x367   :  { %1533 = vst.msk [vmem:[%s2984_s3 + $0x80] sm:$0xff] %vm1516_vm2, %v1410_v34  ;;  %v1419_v38 = vmul.f32 %v2109_v33, %v2771_v3  ;;  %2118 = vrsqrt.f32 %v2833_v36  ;;  %v2843_v39 = vpop.xlane.xlu0 %1269  ;;  %vm1455_vm4 = vcmp.eq.f32.partialorder %v2833_v36, inf  ;;  %vm1457_vm5 = vcmp.eq.f32.partialorder %v2833_v36, 0.0 }
 0x368   :  { %v1414_v40 = vsel %vm1413_vm7, %v2761_v0, %v1412_v35  ;;  %2120 = vrsqrt.f32 %v2843_v39  ;;  %v1458_v9 = vand.u32 2147483648, %v2833_v36  ;;  %vm1462_vm6 = vcmp.eq.f32.partialorder %v2843_v39, inf }
 0x369   :  { %v2111_v42 = vpop.eup %2110  ;;  %v1417_v43 = vsel %vm1415_vm8, %v1416_v37, %v1414_v40  ;;  %v1421_v44 = vsel %vm1420_vm9, %v2771_v3, %v1419_v38  ;;  %v1465_v13 = vand.u32 2147483648, %v2843_v39  ;;  %vm1464_vm7 = vcmp.eq.f32.partialorder %v2843_v39, 0.0 }
 0x36a   :  { %v2113_v45 = vpop.eup %2112  ;;  %1534 = vst.msk [vmem:[%s2984_s3 + $0x88] sm:$0xff] %vm1516_vm2, %v1417_v43  ;;  %v1424_v46 = vsel %vm1422_vm10, %v1423_v41, %v1421_v44  ;;  %v1426_v48 = vmul.f32 %v2111_v42, %v2785_v12  ;;  %v2857_v49 = vpop.xlane.xlu1 %1272 }
 0x36b   :  { %1535 = vst.msk [vmem:[%s2984_s3 + $0x90] sm:$0xff] %vm1516_vm2, %v1424_v46  ;;  %v1433_v51 = vmul.f32 %v2113_v45, %v2795_v47  ;;  %2122 = vrsqrt.f32 %v2857_v49  ;;  %v2867_v52 = vpop.xlane.xlu0 %1275  ;;  %vm1469_vm8 = vcmp.eq.f32.partialorder %v2857_v49, inf  ;;  %v1472_v21 = vand.u32 2147483648, %v2857_v49 }
 0x36c   :  { %v1428_v50 = vsel %vm1427_vm11, %v2785_v12, %v1426_v48  ;;  %2124 = vrsqrt.f32 %v2867_v52  ;;  %vm1471_vm9 = vcmp.eq.f32.partialorder %v2857_v49, 0.0  ;;  %vm1476_vm10 = vcmp.eq.f32.partialorder %v2867_v52, inf }
 0x36d   :  { %v2115_v54 = vpop.eup %2114  ;;  %v1431_v55 = vsel %vm1429_vm12, %v1430_v16, %v1428_v50  ;;  %v1435_v56 = vsel %vm1434_vm13, %v2795_v47, %v1433_v51  ;;  %vm1478_vm11 = vcmp.eq.f32.partialorder %v2867_v52, 0.0 }
 0x36e   :  { %v2117_v57 = vpop.eup %2116  ;;  %1536 = vst.msk [vmem:[%s2984_s3 + $0x98] sm:$0xff] %vm1516_vm2, %v1431_v55  ;;  %v1438_v58 = vsel %vm1436_vm14, %v1437_v53, %v1435_v56  ;;  %v1440_v59 = vmul.f32 %v2115_v54, %v2809_v24  ;;  %v2881_v60 = vpop.xlane.xlu1 %1278 }
 0x36f   :  { %1537 = vst.msk [vmem:[%s2984_s3 + $0xa0] sm:$0xff] %vm1516_vm2, %v1438_v58  ;;  %v1447_v62 = vmul.f32 %v2117_v57, %v2819_v27  ;;  %2126 = vrsqrt.f32 %v2881_v60  ;;  %v2891_v63 = vpop.xlane.xlu0 %1281  ;;  %vm1483_vm12 = vcmp.eq.f32.partialorder %v2881_v60, inf  ;;  %v1486_v31 = vand.u32 2147483648, %v2881_v60 }
 0x370   :  { %v1442_v0 = vsel %vm1441_vm15, %v2809_v24, %v1440_v59  ;;  %2128 = vrsqrt.f32 %v2891_v63  ;;  %v1479_v24 = vand.u32 2147483648, %v2867_v52  ;;  %vm1485_vm13 = vcmp.eq.f32.partialorder %v2881_v60, 0.0 }
 0x371   :  { %v2119_v2 = vpop.eup %2118  ;;  %v1445_v3 = vsel %vm1443_vm0, %v1444_v61, %v1442_v0  ;;  %v1449_v4 = vsel %vm1448_vm1, %v2819_v27, %v1447_v62  ;;  %vm1490_vm14 = vcmp.eq.f32.partialorder %v2891_v63, inf  ;;  %v1493_v34 = vand.u32 2147483648, %v2891_v63 }
 0x372   :  { %v2121_v5 = vpop.eup %2120  ;;  %1538 = vst.msk [vmem:[%s2984_s3 + $0xa8] sm:$0xff] %vm1516_vm2, %v1445_v3  ;;  %v1452_v6 = vsel %vm1450_vm3, %v1451_v1, %v1449_v4  ;;  %v1454_v7 = vmul.f32 %v2119_v2, %v2833_v36  ;;  %v2905_v8 = vpop.xlane.xlu1 %1284  ;;  %vm1492_vm15 = vcmp.eq.f32.partialorder %v2891_v63, 0.0 }
 0x373   :  { %1539 = vst.msk [vmem:[%s2984_s3 + $0xb0] sm:$0xff] %vm1516_vm2, %v1452_v6  ;;  %v1461_v10 = vmul.f32 %v2121_v5, %v2843_v39  ;;  %2130 = vrsqrt.f32 %v2905_v8  ;;  %v1288_v11 = vpop.xlane.xlu0 %1287  ;;  %vm1497_vm0 = vcmp.eq.f32.partialorder %v2905_v8, inf  ;;  %v1500_v41 = vand.u32 2147483648, %v2905_v8 }
 0x374   :  { %v1456_v12 = vsel %vm1455_vm4, %v2833_v36, %v1454_v7  ;;  %2132 = vrsqrt.f32 %v1288_v11  ;;  %vm1499_vm1 = vcmp.eq.f32.partialorder %v2905_v8, 0.0  ;;  %vm1504_vm3 = vcmp.eq.f32.partialorder %v1288_v11, inf }
 0x375   :  { %v2123_v14 = vpop.eup %2122  ;;  %v1459_v47 = vsel %vm1457_vm5, %v1458_v9, %v1456_v12  ;;  %v1463_v15 = vsel %vm1462_vm6, %v2843_v39, %v1461_v10  ;;  %v1507_v44 = vand.u32 2147483648, %v1288_v11  ;;  %vm1506_vm4 = vcmp.eq.f32.partialorder %v1288_v11, 0.0 }
 0x376   :  { %v2125_v17 = vpop.eup %2124  ;;  %1540 = vst.msk [vmem:[%s2984_s3 + $0xb8] sm:$0xff] %vm1516_vm2, %v1459_v47  ;;  %v1466_v18 = vsel %vm1464_vm7, %v1465_v13, %v1463_v15  ;;  %v1468_v19 = vmul.f32 %v2123_v14, %v2857_v49  ;;  %v1291_v20 = vpop.xlane.xlu1 %1290 }
 0x377   :  { %1541 = vst.msk [vmem:[%s2984_s3 + $0xc0] sm:$0xff] %vm1516_vm2, %v1466_v18  ;;  %v1475_v22 = vmul.f32 %v2125_v17, %v2867_v52  ;;  %2134 = vrsqrt.f32 %v1291_v20  ;;  %vm1511_vm5 = vcmp.eq.f32.partialorder %v1291_v20, inf  ;;  %v1514_v51 = vand.u32 2147483648, %v1291_v20 }
 0x378   :  { %v1470_v23 = vsel %vm1469_vm8, %v2857_v49, %v1468_v19  ;;  %vm1513_vm6 = vcmp.eq.f32.partialorder %v1291_v20, 0.0 }
 0x379   :  { %v2127_v25 = vpop.eup %2126  ;;  %v1473_v26 = vsel %vm1471_vm9, %v1472_v21, %v1470_v23  ;;  %v1477_v27 = vsel %vm1476_vm10, %v2867_v52, %v1475_v22 }
 0x37a   :  { %v2129_v28 = vpop.eup %2128  ;;  %1542 = vst.msk [vmem:[%s2984_s3 + $0xc8] sm:$0xff] %vm1516_vm2, %v1473_v26  ;;  %v1480_v29 = vsel %vm1478_vm11, %v1479_v24, %v1477_v27  ;;  %v1482_v30 = vmul.f32 %v2127_v25, %v2881_v60 }
 0x37b   :  { %1543 = vst.msk [vmem:[%s2984_s3 + $0xd0] sm:$0xff] %vm1516_vm2, %v1480_v29  ;;  %v1489_v32 = vmul.f32 %v2129_v28, %v2891_v63 }
 0x37c   :  { %v1484_v33 = vsel %vm1483_vm12, %v2881_v60, %v1482_v30 }
 0x37d   :  { %v2131_v35 = vpop.eup %2130  ;;  %v1487_v36 = vsel %vm1485_vm13, %v1486_v31, %v1484_v33  ;;  %v1491_v37 = vsel %vm1490_vm14, %v2891_v63, %v1489_v32 }
 0x37e   :  { %v2133_v38 = vpop.eup %2132  ;;  %1544 = vst.msk [vmem:[%s2984_s3 + $0xd8] sm:$0xff] %vm1516_vm2, %v1487_v36  ;;  %v1494_v39 = vsel %vm1492_vm15, %v1493_v34, %v1491_v37  ;;  %v1496_v40 = vmul.f32 %v2131_v35, %v2905_v8 }
 0x37f   :  { %1545 = vst.msk [vmem:[%s2984_s3 + $0xe0] sm:$0xff] %vm1516_vm2, %v1494_v39  ;;  %v1503_v42 = vmul.f32 %v2133_v38, %v1288_v11 }
 0x380   :  { %v1498_v43 = vsel %vm1497_vm0, %v2905_v8, %v1496_v40 }
 0x381   :  { %v2135_v45 = vpop.eup %2134  ;;  %v1501_v46 = vsel %vm1499_vm1, %v1500_v41, %v1498_v43  ;;  %v1505_v48 = vsel %vm1504_vm3, %v1288_v11, %v1503_v42 }
 0x382   :  { %1546 = vst.msk [vmem:[%s2984_s3 + $0xe8] sm:$0xff] %vm1516_vm2, %v1501_v46  ;;  %v1508_v49 = vsel %vm1506_vm4, %v1507_v44, %v1505_v48  ;;  %v1510_v16 = vmul.f32 %v2135_v45, %v1291_v20 }
 0x383   :  { %1547 = vst.msk [vmem:[%s2984_s3 + $0xf0] sm:$0xff] %vm1516_vm2, %v1508_v49 }
 0x384   :  { %v1512_v52 = vsel %vm1511_vm5, %v1291_v20, %v1510_v16 }
 0x385   :  { %v1515_v50 = vsel %vm1513_vm6, %v1514_v51, %v1512_v52 }
 0x386   :  { %1548 = vst.msk [vmem:[%s2984_s3 + $0xf8] sm:$0xff] %vm1516_vm2, %v1515_v50 }

</bundles_post_ra>
